<compile_context>
chip_gen: v5e
topology: v5e:2x2
jax: 0.10.0
libtpu: 0.0.40
codegen_flags: <defaults>
</compile_context>

<pallas_src>
import jax
import jax.numpy as jnp
from jax.experimental import pallas as pl
from jax.experimental.pallas import tpu as pltpu


def _make_alstm_kernel(T, BP, H):
    """Build the kernel with static T (seq len), BP (padded batch), H (hidden)."""

    def kernel(x_ref, wih1_ref, whh1_ref, b1_ref, w2_ref, b2_ref,
               w_omega_ref, u_omega_ref, wdec_ref, bdec_ref, out_ref):
        f32 = jnp.float32

        # Hoisted layer-1 input projection: one matmul covers every timestep.
        xg1 = (jnp.dot(x_ref[...], wih1_ref[...], preferred_element_type=f32)
               + b1_ref[...])                              # (T*BP, 4H)
        whh1 = whh1_ref[...]                               # (H, 4H)
        w2 = w2_ref[...]                                   # (2H, 4H) = [Wih2; Whh2]
        b2 = b2_ref[...]                                   # (1, 4H)

        def cell(gates, c):
            # gate columns are pre-permuted to (i, f, o, g)
            sig = jax.nn.sigmoid(gates[:, :3 * H])         # i, f, o in one EUP pass
            i = sig[:, 0:H]
            f = sig[:, H:2 * H]
            o = sig[:, 2 * H:3 * H]
            g = jnp.tanh(gates[:, 3 * H:])
            c_new = f * c + i * g
            h_new = o * jnp.tanh(c_new)
            return h_new, c_new

        zero = jnp.zeros((BP, H), f32)
        h1, c1, h2, c2 = zero, zero, zero, zero
        outs = []
        for t in range(T):   # static unroll; register-carried recurrent state
            gates1 = (xg1[t * BP:(t + 1) * BP, :]
                      + jnp.dot(h1, whh1, preferred_element_type=f32))
            h1, c1 = cell(gates1, c1)
            gates2 = (jnp.dot(jnp.concatenate([h1, h2], axis=-1), w2,
                              preferred_element_type=f32) + b2)
            h2, c2 = cell(gates2, c2)
            outs.append(h2)

        flat = jnp.concatenate(outs, axis=0)               # (T*BP, H), lane-dense

        # attention: u = tanh(out @ w_omega); att = <u, u_omega>; softmax over time
        u = jnp.tanh(jnp.dot(flat, w_omega_ref[...], preferred_element_type=f32))
        attf = jnp.sum(u * u_omega_ref[...], axis=-1, keepdims=True)   # (T*BP, 1), VPU/XLU
        # gather the per-time columns into a (BP, T) matrix; softmax over lanes
        att_bt = jnp.concatenate(
            [attf[t * BP:(t + 1) * BP, :] for t in range(T)], axis=1)  # (BP, T)
        att_bt = att_bt - jnp.max(att_bt, axis=1, keepdims=True)
        e = jnp.exp(att_bt)
        score = e / jnp.sum(e, axis=1, keepdims=True)                  # (BP, T)

        feat = outs[0] * score[:, 0:1]
        for t in range(1, T):
            feat = feat + outs[t] * score[:, t:t + 1]                  # (BP, H)

        logits = (jnp.dot(feat, wdec_ref[...], preferred_element_type=f32)
                  + bdec_ref[...])
        out_ref[...] = jnp.tanh(logits)

    return kernel


def alstm_forward(x, params):
    """x: (B, T, I) batch-first, float32.  Returns (B, 2)."""
    B, T, I = x.shape
    H = params["w_omega"].shape[0]
    BP = ((B + 7) // 8) * 8          # pad batch to a full sublane tile

    def permute_gates(w):
        # PyTorch gate order (i, f, g, o) -> (i, f, o, g) along the leading axis
        return jnp.concatenate([w[:2 * H], w[3 * H:], w[2 * H:3 * H]], axis=0)

    wih1 = permute_gates(params["wih1"]).T                               # (I, 4H)
    whh1 = permute_gates(params["whh1"]).T                               # (H, 4H)
    b1 = permute_gates(params["bih1"] + params["bhh1"]).reshape(1, 4 * H)
    w2 = jnp.concatenate([permute_gates(params["wih2"]).T,
                          permute_gates(params["whh2"]).T], axis=0)      # (2H, 4H)
    b2 = permute_gates(params["bih2"] + params["bhh2"]).reshape(1, 4 * H)

    x_tm = jnp.transpose(x, (1, 0, 2)).astype(jnp.float32)               # (T, B, I)
    x_tm = jnp.pad(x_tm, ((0, 0), (0, BP - B), (0, 0)))                  # (T, BP, I)
    x_flat = x_tm.reshape(T * BP, I)

    args = (x_flat, wih1, whh1, b1, w2, b2,
            params["w_omega"], params["u_omega"].reshape(1, H),
            params["wdec"].T, params["bdec"].reshape(1, 2))

    vmem = pl.BlockSpec(memory_space=pltpu.MemorySpace.VMEM)
    # Total resident data is a few tens of KiB: everything fits in VMEM, so no
    # grid / BlockSpec pipelining is used.
    # TODO(synk): for large batches, add a batch grid axis with
    # dimension_semantics=("parallel",) so v7x's second TensorCore is used.
    out = pl.pallas_call(
        _make_alstm_kernel(T, BP, H),
        out_shape=jax.ShapeDtypeStruct((BP, 2), jnp.float32),
        in_specs=[vmem] * len(args),
        out_specs=vmem,
    )(*args)
    return out[:B]


def alstm_reference(x, params):
    """Pure-JAX reference of the PyTorch forward (dropout = identity)."""
    H = params["w_omega"].shape[0]

    def cell(x_t, h, c, wih, whh, bih, bhh):
        g = x_t @ wih.T + h @ whh.T + bih + bhh
        i, f, gg, o = (jax.nn.sigmoid(g[:, :H]), jax.nn.sigmoid(g[:, H:2 * H]),
                       jnp.tanh(g[:, 2 * H:3 * H]), jax.nn.sigmoid(g[:, 3 * H:]))
        c = f * c + i * gg
        return o * jnp.tanh(c), c

    B, T, _ = x.shape
    h1 = c1 = h2 = c2 = jnp.zeros((B, H), jnp.float32)
    outs = []
    for t in range(T):
        h1, c1 = cell(x[:, t], h1, c1, params["wih1"], params["whh1"],
                      params["bih1"], params["bhh1"])
        h2, c2 = cell(h1, h2, c2, params["wih2"], params["whh2"],
                      params["bih2"], params["bhh2"])
        outs.append(h2)
    out = jnp.stack(outs, axis=1)                                        # (B, T, H)
    u = jnp.tanh(out @ params["w_omega"])
    att = u @ params["u_omega"]                                          # (B, T, 1)
    score = jax.nn.softmax(att, axis=1)
    feat = jnp.sum(out * score, axis=1)
    return jnp.tanh(feat @ params["wdec"].T + params["bdec"])


def make_params(key, input_size, hidden_size):
    H, I = hidden_size, input_size
    ks = jax.random.split(key, 12)
    s = 1.0 / jnp.sqrt(H)
    u = lambda k, shp, lim: jax.random.uniform(k, shp, jnp.float32, -lim, lim)
    return {
        "wih1": u(ks[0], (4 * H, I), s), "whh1": u(ks[1], (4 * H, H), s),
        "bih1": u(ks[2], (4 * H,), s),   "bhh1": u(ks[3], (4 * H,), s),
        "wih2": u(ks[4], (4 * H, H), s), "whh2": u(ks[5], (4 * H, H), s),
        "bih2": u(ks[6], (4 * H,), s),   "bhh2": u(ks[7], (4 * H,), s),
        "w_omega": u(ks[8], (H, H), 0.1), "u_omega": u(ks[9], (H, 1), 0.1),
        "wdec": u(ks[10], (2, H), s),     "bdec": u(ks[11], (2,), s),
    }


if __name__ == "__main__":
    B, T, I, H = 4, 8, 16, 32
    key = jax.random.PRNGKey(0)
    kx, kp = jax.random.split(key)
    x = jax.random.normal(kx, (B, T, I), jnp.float32)
    params = make_params(kp, I, H)

    out = jax.block_until_ready(jax.jit(alstm_forward)(x, params))
    ref = jax.block_until_ready(alstm_reference(x, params))

    assert out.shape == (B, 2)
    assert jnp.all(jnp.isfinite(out))
    assert jnp.allclose(out, ref, atol=1e-4, rtol=1e-4)
    print("KERNEL_OK")
</pallas_src>

<mosaic_0001>
module attributes {stable_mosaic.version = 11 : i64} {
  func.func @kernel(%arg0: memref<64x16xf32, #tpu.memory_space<vmem>>, %arg1: memref<16x128xf32, #tpu.memory_space<vmem>>, %arg2: memref<32x128xf32, #tpu.memory_space<vmem>>, %arg3: memref<1x128xf32, #tpu.memory_space<vmem>>, %arg4: memref<64x128xf32, #tpu.memory_space<vmem>>, %arg5: memref<1x128xf32, #tpu.memory_space<vmem>>, %arg6: memref<32x32xf32, #tpu.memory_space<vmem>>, %arg7: memref<1x32xf32, #tpu.memory_space<vmem>>, %arg8: memref<32x2xf32, #tpu.memory_space<vmem>>, %arg9: memref<1x2xf32, #tpu.memory_space<vmem>>, %arg10: memref<8x2xf32, #tpu.memory_space<vmem>>) attributes {dimension_semantics = [], scalar_prefetch = 0 : i64, scratch_operands = 0 : i64, tpu.core_type = #tpu.core_type<tc>} {
    %c0 = arith.constant 0 : index
    %c0_0 = arith.constant 0 : index
    %0 = vector.load %arg0[%c0, %c0_0] : memref<64x16xf32, #tpu.memory_space<vmem>>, vector<64x16xf32>
    %c0_1 = arith.constant 0 : index
    %c0_2 = arith.constant 0 : index
    %1 = vector.load %arg1[%c0_1, %c0_2] : memref<16x128xf32, #tpu.memory_space<vmem>>, vector<16x128xf32>
    %cst = arith.constant dense<0.000000e+00> : vector<64x128xf32>
    %2 = tpu.matmul %0, %1, %cst {dimension_numbers = #tpu.dot_dimension_numbers<[1], [0], [0], [1], [0, 0, 1, 1], [], []>} : vector<64x16xf32>, vector<16x128xf32>, vector<64x128xf32> -> vector<64x128xf32>
    %c0_3 = arith.constant 0 : index
    %c0_4 = arith.constant 0 : index
    %3 = vector.load %arg3[%c0_3, %c0_4] : memref<1x128xf32, #tpu.memory_space<vmem>>, vector<1x128xf32>
    %4 = vector.broadcast %3 : vector<1x128xf32> to vector<64x128xf32>
    %5 = arith.addf %2, %4 : vector<64x128xf32>
    %c0_5 = arith.constant 0 : index
    %c0_6 = arith.constant 0 : index
    %6 = vector.load %arg2[%c0_5, %c0_6] : memref<32x128xf32, #tpu.memory_space<vmem>>, vector<32x128xf32>
    %c0_7 = arith.constant 0 : index
    %c0_8 = arith.constant 0 : index
    %7 = vector.load %arg4[%c0_7, %c0_8] : memref<64x128xf32, #tpu.memory_space<vmem>>, vector<64x128xf32>
    %c0_9 = arith.constant 0 : index
    %c0_10 = arith.constant 0 : index
    %8 = vector.load %arg5[%c0_9, %c0_10] : memref<1x128xf32, #tpu.memory_space<vmem>>, vector<1x128xf32>
    %cst_11 = arith.constant 0.000000e+00 : f32
    %9 = vector.broadcast %cst_11 : f32 to vector<8x32xf32>
    %10 = vector.extract_strided_slice %5 {offsets = [0, 0], sizes = [8, 128], strides = [1, 1]} : vector<64x128xf32> to vector<8x128xf32>
    %cst_12 = arith.constant dense<0.000000e+00> : vector<8x128xf32>
    %11 = tpu.matmul %9, %6, %cst_12 {dimension_numbers = #tpu.dot_dimension_numbers<[1], [0], [0], [1], [0, 0, 1, 1], [], []>} : vector<8x32xf32>, vector<32x128xf32>, vector<8x128xf32> -> vector<8x128xf32>
    %12 = arith.addf %10, %11 : vector<8x128xf32>
    %13 = vector.extract_strided_slice %12 {offsets = [0, 0], sizes = [8, 96], strides = [1, 1]} : vector<8x128xf32> to vector<8x96xf32>
    %14 = arith.negf %13 : vector<8x96xf32>
    %15 = math.exp %14 : vector<8x96xf32>
    %cst_13 = arith.constant 1.000000e+00 : f32
    %16 = vector.broadcast %cst_13 : f32 to vector<8x96xf32>
    %17 = arith.addf %16, %15 : vector<8x96xf32>
    %18 = arith.divf %16, %17 : vector<8x96xf32>
    %19 = vector.extract_strided_slice %18 {offsets = [0, 0], sizes = [8, 32], strides = [1, 1]} : vector<8x96xf32> to vector<8x32xf32>
    %20 = vector.extract_strided_slice %18 {offsets = [0, 32], sizes = [8, 32], strides = [1, 1]} : vector<8x96xf32> to vector<8x32xf32>
    %21 = vector.extract_strided_slice %18 {offsets = [0, 64], sizes = [8, 32], strides = [1, 1]} : vector<8x96xf32> to vector<8x32xf32>
    %22 = vector.extract_strided_slice %12 {offsets = [0, 96], sizes = [8, 32], strides = [1, 1]} : vector<8x128xf32> to vector<8x32xf32>
    %23 = math.tanh %22 : vector<8x32xf32>
    %24 = arith.mulf %20, %9 : vector<8x32xf32>
    %25 = arith.mulf %19, %23 : vector<8x32xf32>
    %26 = arith.addf %24, %25 : vector<8x32xf32>
    %27 = math.tanh %26 : vector<8x32xf32>
    %28 = arith.mulf %21, %27 : vector<8x32xf32>
    %29 = tpu.concatenate %28, %9 in 1 : vector<8x32xf32>, vector<8x32xf32> -> vector<8x64xf32>
    %cst_14 = arith.constant dense<0.000000e+00> : vector<8x128xf32>
    %30 = tpu.matmul %29, %7, %cst_14 {dimension_numbers = #tpu.dot_dimension_numbers<[1], [0], [0], [1], [0, 0, 1, 1], [], []>} : vector<8x64xf32>, vector<64x128xf32>, vector<8x128xf32> -> vector<8x128xf32>
    %31 = vector.broadcast %8 : vector<1x128xf32> to vector<8x128xf32>
    %32 = arith.addf %30, %31 : vector<8x128xf32>
    %33 = vector.extract_strided_slice %32 {offsets = [0, 0], sizes = [8, 96], strides = [1, 1]} : vector<8x128xf32> to vector<8x96xf32>
    %34 = arith.negf %33 : vector<8x96xf32>
    %35 = math.exp %34 : vector<8x96xf32>
    %cst_15 = arith.constant 1.000000e+00 : f32
    %36 = vector.broadcast %cst_15 : f32 to vector<8x96xf32>
    %37 = arith.addf %36, %35 : vector<8x96xf32>
    %38 = arith.divf %36, %37 : vector<8x96xf32>
    %39 = vector.extract_strided_slice %38 {offsets = [0, 0], sizes = [8, 32], strides = [1, 1]} : vector<8x96xf32> to vector<8x32xf32>
    %40 = vector.extract_strided_slice %38 {offsets = [0, 32], sizes = [8, 32], strides = [1, 1]} : vector<8x96xf32> to vector<8x32xf32>
    %41 = vector.extract_strided_slice %38 {offsets = [0, 64], sizes = [8, 32], strides = [1, 1]} : vector<8x96xf32> to vector<8x32xf32>
    %42 = vector.extract_strided_slice %32 {offsets = [0, 96], sizes = [8, 32], strides = [1, 1]} : vector<8x128xf32> to vector<8x32xf32>
    %43 = math.tanh %42 : vector<8x32xf32>
    %44 = arith.mulf %40, %9 : vector<8x32xf32>
    %45 = arith.mulf %39, %43 : vector<8x32xf32>
    %46 = arith.addf %44, %45 : vector<8x32xf32>
    %47 = math.tanh %46 : vector<8x32xf32>
    %48 = arith.mulf %41, %47 : vector<8x32xf32>
    %49 = vector.extract_strided_slice %5 {offsets = [8, 0], sizes = [8, 128], strides = [1, 1]} : vector<64x128xf32> to vector<8x128xf32>
    %cst_16 = arith.constant dense<0.000000e+00> : vector<8x128xf32>
    %50 = tpu.matmul %28, %6, %cst_16 {dimension_numbers = #tpu.dot_dimension_numbers<[1], [0], [0], [1], [0, 0, 1, 1], [], []>} : vector<8x32xf32>, vector<32x128xf32>, vector<8x128xf32> -> vector<8x128xf32>
    %51 = arith.addf %49, %50 : vector<8x128xf32>
    %52 = vector.extract_strided_slice %51 {offsets = [0, 0], sizes = [8, 96], strides = [1, 1]} : vector<8x128xf32> to vector<8x96xf32>
    %53 = arith.negf %52 : vector<8x96xf32>
    %54 = math.exp %53 : vector<8x96xf32>
    %cst_17 = arith.constant 1.000000e+00 : f32
    %55 = vector.broadcast %cst_17 : f32 to vector<8x96xf32>
    %56 = arith.addf %55, %54 : vector<8x96xf32>
    %57 = arith.divf %55, %56 : vector<8x96xf32>
    %58 = vector.extract_strided_slice %57 {offsets = [0, 0], sizes = [8, 32], strides = [1, 1]} : vector<8x96xf32> to vector<8x32xf32>
    %59 = vector.extract_strided_slice %57 {offsets = [0, 32], sizes = [8, 32], strides = [1, 1]} : vector<8x96xf32> to vector<8x32xf32>
    %60 = vector.extract_strided_slice %57 {offsets = [0, 64], sizes = [8, 32], strides = [1, 1]} : vector<8x96xf32> to vector<8x32xf32>
    %61 = vector.extract_strided_slice %51 {offsets = [0, 96], sizes = [8, 32], strides = [1, 1]} : vector<8x128xf32> to vector<8x32xf32>
    %62 = math.tanh %61 : vector<8x32xf32>
    %63 = arith.mulf %59, %26 : vector<8x32xf32>
    %64 = arith.mulf %58, %62 : vector<8x32xf32>
    %65 = arith.addf %63, %64 : vector<8x32xf32>
    %66 = math.tanh %65 : vector<8x32xf32>
    %67 = arith.mulf %60, %66 : vector<8x32xf32>
    %68 = tpu.concatenate %67, %48 in 1 : vector<8x32xf32>, vector<8x32xf32> -> vector<8x64xf32>
    %cst_18 = arith.constant dense<0.000000e+00> : vector<8x128xf32>
    %69 = tpu.matmul %68, %7, %cst_18 {dimension_numbers = #tpu.dot_dimension_numbers<[1], [0], [0], [1], [0, 0, 1, 1], [], []>} : vector<8x64xf32>, vector<64x128xf32>, vector<8x128xf32> -> vector<8x128xf32>
    %70 = vector.broadcast %8 : vector<1x128xf32> to vector<8x128xf32>
    %71 = arith.addf %69, %70 : vector<8x128xf32>
    %72 = vector.extract_strided_slice %71 {offsets = [0, 0], sizes = [8, 96], strides = [1, 1]} : vector<8x128xf32> to vector<8x96xf32>
    %73 = arith.negf %72 : vector<8x96xf32>
    %74 = math.exp %73 : vector<8x96xf32>
    %cst_19 = arith.constant 1.000000e+00 : f32
    %75 = vector.broadcast %cst_19 : f32 to vector<8x96xf32>
    %76 = arith.addf %75, %74 : vector<8x96xf32>
    %77 = arith.divf %75, %76 : vector<8x96xf32>
    %78 = vector.extract_strided_slice %77 {offsets = [0, 0], sizes = [8, 32], strides = [1, 1]} : vector<8x96xf32> to vector<8x32xf32>
    %79 = vector.extract_strided_slice %77 {offsets = [0, 32], sizes = [8, 32], strides = [1, 1]} : vector<8x96xf32> to vector<8x32xf32>
    %80 = vector.extract_strided_slice %77 {offsets = [0, 64], sizes = [8, 32], strides = [1, 1]} : vector<8x96xf32> to vector<8x32xf32>
    %81 = vector.extract_strided_slice %71 {offsets = [0, 96], sizes = [8, 32], strides = [1, 1]} : vector<8x128xf32> to vector<8x32xf32>
    %82 = math.tanh %81 : vector<8x32xf32>
    %83 = arith.mulf %79, %46 : vector<8x32xf32>
    %84 = arith.mulf %78, %82 : vector<8x32xf32>
    %85 = arith.addf %83, %84 : vector<8x32xf32>
    %86 = math.tanh %85 : vector<8x32xf32>
    %87 = arith.mulf %80, %86 : vector<8x32xf32>
    %88 = vector.extract_strided_slice %5 {offsets = [16, 0], sizes = [8, 128], strides = [1, 1]} : vector<64x128xf32> to vector<8x128xf32>
    %cst_20 = arith.constant dense<0.000000e+00> : vector<8x128xf32>
    %89 = tpu.matmul %67, %6, %cst_20 {dimension_numbers = #tpu.dot_dimension_numbers<[1], [0], [0], [1], [0, 0, 1, 1], [], []>} : vector<8x32xf32>, vector<32x128xf32>, vector<8x128xf32> -> vector<8x128xf32>
    %90 = arith.addf %88, %89 : vector<8x128xf32>
    %91 = vector.extract_strided_slice %90 {offsets = [0, 0], sizes = [8, 96], strides = [1, 1]} : vector<8x128xf32> to vector<8x96xf32>
    %92 = arith.negf %91 : vector<8x96xf32>
    %93 = math.exp %92 : vector<8x96xf32>
    %cst_21 = arith.constant 1.000000e+00 : f32
    %94 = vector.broadcast %cst_21 : f32 to vector<8x96xf32>
    %95 = arith.addf %94, %93 : vector<8x96xf32>
    %96 = arith.divf %94, %95 : vector<8x96xf32>
    %97 = vector.extract_strided_slice %96 {offsets = [0, 0], sizes = [8, 32], strides = [1, 1]} : vector<8x96xf32> to vector<8x32xf32>
    %98 = vector.extract_strided_slice %96 {offsets = [0, 32], sizes = [8, 32], strides = [1, 1]} : vector<8x96xf32> to vector<8x32xf32>
    %99 = vector.extract_strided_slice %96 {offsets = [0, 64], sizes = [8, 32], strides = [1, 1]} : vector<8x96xf32> to vector<8x32xf32>
    %100 = vector.extract_strided_slice %90 {offsets = [0, 96], sizes = [8, 32], strides = [1, 1]} : vector<8x128xf32> to vector<8x32xf32>
    %101 = math.tanh %100 : vector<8x32xf32>
    %102 = arith.mulf %98, %65 : vector<8x32xf32>
    %103 = arith.mulf %97, %101 : vector<8x32xf32>
    %104 = arith.addf %102, %103 : vector<8x32xf32>
    %105 = math.tanh %104 : vector<8x32xf32>
    %106 = arith.mulf %99, %105 : vector<8x32xf32>
    %107 = tpu.concatenate %106, %87 in 1 : vector<8x32xf32>, vector<8x32xf32> -> vector<8x64xf32>
    %cst_22 = arith.constant dense<0.000000e+00> : vector<8x128xf32>
    %108 = tpu.matmul %107, %7, %cst_22 {dimension_numbers = #tpu.dot_dimension_numbers<[1], [0], [0], [1], [0, 0, 1, 1], [], []>} : vector<8x64xf32>, vector<64x128xf32>, vector<8x128xf32> -> vector<8x128xf32>
    %109 = vector.broadcast %8 : vector<1x128xf32> to vector<8x128xf32>
    %110 = arith.addf %108, %109 : vector<8x128xf32>
    %111 = vector.extract_strided_slice %110 {offsets = [0, 0], sizes = [8, 96], strides = [1, 1]} : vector<8x128xf32> to vector<8x96xf32>
    %112 = arith.negf %111 : vector<8x96xf32>
    %113 = math.exp %112 : vector<8x96xf32>
    %cst_23 = arith.constant 1.000000e+00 : f32
    %114 = vector.broadcast %cst_23 : f32 to vector<8x96xf32>
    %115 = arith.addf %114, %113 : vector<8x96xf32>
    %116 = arith.divf %114, %115 : vector<8x96xf32>
    %117 = vector.extract_strided_slice %116 {offsets = [0, 0], sizes = [8, 32], strides = [1, 1]} : vector<8x96xf32> to vector<8x32xf32>
    %118 = vector.extract_strided_slice %116 {offsets = [0, 32], sizes = [8, 32], strides = [1, 1]} : vector<8x96xf32> to vector<8x32xf32>
    %119 = vector.extract_strided_slice %116 {offsets = [0, 64], sizes = [8, 32], strides = [1, 1]} : vector<8x96xf32> to vector<8x32xf32>
    %120 = vector.extract_strided_slice %110 {offsets = [0, 96], sizes = [8, 32], strides = [1, 1]} : vector<8x128xf32> to vector<8x32xf32>
    %121 = math.tanh %120 : vector<8x32xf32>
    %122 = arith.mulf %118, %85 : vector<8x32xf32>
    %123 = arith.mulf %117, %121 : vector<8x32xf32>
    %124 = arith.addf %122, %123 : vector<8x32xf32>
    %125 = math.tanh %124 : vector<8x32xf32>
    %126 = arith.mulf %119, %125 : vector<8x32xf32>
    %127 = vector.extract_strided_slice %5 {offsets = [24, 0], sizes = [8, 128], strides = [1, 1]} : vector<64x128xf32> to vector<8x128xf32>
    %cst_24 = arith.constant dense<0.000000e+00> : vector<8x128xf32>
    %128 = tpu.matmul %106, %6, %cst_24 {dimension_numbers = #tpu.dot_dimension_numbers<[1], [0], [0], [1], [0, 0, 1, 1], [], []>} : vector<8x32xf32>, vector<32x128xf32>, vector<8x128xf32> -> vector<8x128xf32>
    %129 = arith.addf %127, %128 : vector<8x128xf32>
    %130 = vector.extract_strided_slice %129 {offsets = [0, 0], sizes = [8, 96], strides = [1, 1]} : vector<8x128xf32> to vector<8x96xf32>
    %131 = arith.negf %130 : vector<8x96xf32>
    %132 = math.exp %131 : vector<8x96xf32>
    %cst_25 = arith.constant 1.000000e+00 : f32
    %133 = vector.broadcast %cst_25 : f32 to vector<8x96xf32>
    %134 = arith.addf %133, %132 : vector<8x96xf32>
    %135 = arith.divf %133, %134 : vector<8x96xf32>
    %136 = vector.extract_strided_slice %135 {offsets = [0, 0], sizes = [8, 32], strides = [1, 1]} : vector<8x96xf32> to vector<8x32xf32>
    %137 = vector.extract_strided_slice %135 {offsets = [0, 32], sizes = [8, 32], strides = [1, 1]} : vector<8x96xf32> to vector<8x32xf32>
    %138 = vector.extract_strided_slice %135 {offsets = [0, 64], sizes = [8, 32], strides = [1, 1]} : vector<8x96xf32> to vector<8x32xf32>
    %139 = vector.extract_strided_slice %129 {offsets = [0, 96], sizes = [8, 32], strides = [1, 1]} : vector<8x128xf32> to vector<8x32xf32>
    %140 = math.tanh %139 : vector<8x32xf32>
    %141 = arith.mulf %137, %104 : vector<8x32xf32>
    %142 = arith.mulf %136, %140 : vector<8x32xf32>
    %143 = arith.addf %141, %142 : vector<8x32xf32>
    %144 = math.tanh %143 : vector<8x32xf32>
    %145 = arith.mulf %138, %144 : vector<8x32xf32>
    %146 = tpu.concatenate %145, %126 in 1 : vector<8x32xf32>, vector<8x32xf32> -> vector<8x64xf32>
    %cst_26 = arith.constant dense<0.000000e+00> : vector<8x128xf32>
    %147 = tpu.matmul %146, %7, %cst_26 {dimension_numbers = #tpu.dot_dimension_numbers<[1], [0], [0], [1], [0, 0, 1, 1], [], []>} : vector<8x64xf32>, vector<64x128xf32>, vector<8x128xf32> -> vector<8x128xf32>
    %148 = vector.broadcast %8 : vector<1x128xf32> to vector<8x128xf32>
    %149 = arith.addf %147, %148 : vector<8x128xf32>
    %150 = vector.extract_strided_slice %149 {offsets = [0, 0], sizes = [8, 96], strides = [1, 1]} : vector<8x128xf32> to vector<8x96xf32>
    %151 = arith.negf %150 : vector<8x96xf32>
    %152 = math.exp %151 : vector<8x96xf32>
    %cst_27 = arith.constant 1.000000e+00 : f32
    %153 = vector.broadcast %cst_27 : f32 to vector<8x96xf32>
    %154 = arith.addf %153, %152 : vector<8x96xf32>
    %155 = arith.divf %153, %154 : vector<8x96xf32>
    %156 = vector.extract_strided_slice %155 {offsets = [0, 0], sizes = [8, 32], strides = [1, 1]} : vector<8x96xf32> to vector<8x32xf32>
    %157 = vector.extract_strided_slice %155 {offsets = [0, 32], sizes = [8, 32], strides = [1, 1]} : vector<8x96xf32> to vector<8x32xf32>
    %158 = vector.extract_strided_slice %155 {offsets = [0, 64], sizes = [8, 32], strides = [1, 1]} : vector<8x96xf32> to vector<8x32xf32>
    %159 = vector.extract_strided_slice %149 {offsets = [0, 96], sizes = [8, 32], strides = [1, 1]} : vector<8x128xf32> to vector<8x32xf32>
    %160 = math.tanh %159 : vector<8x32xf32>
    %161 = arith.mulf %157, %124 : vector<8x32xf32>
    %162 = arith.mulf %156, %160 : vector<8x32xf32>
    %163 = arith.addf %161, %162 : vector<8x32xf32>
    %164 = math.tanh %163 : vector<8x32xf32>
    %165 = arith.mulf %158, %164 : vector<8x32xf32>
    %166 = vector.extract_strided_slice %5 {offsets = [32, 0], sizes = [8, 128], strides = [1, 1]} : vector<64x128xf32> to vector<8x128xf32>
    %cst_28 = arith.constant dense<0.000000e+00> : vector<8x128xf32>
    %167 = tpu.matmul %145, %6, %cst_28 {dimension_numbers = #tpu.dot_dimension_numbers<[1], [0], [0], [1], [0, 0, 1, 1], [], []>} : vector<8x32xf32>, vector<32x128xf32>, vector<8x128xf32> -> vector<8x128xf32>
    %168 = arith.addf %166, %167 : vector<8x128xf32>
    %169 = vector.extract_strided_slice %168 {offsets = [0, 0], sizes = [8, 96], strides = [1, 1]} : vector<8x128xf32> to vector<8x96xf32>
    %170 = arith.negf %169 : vector<8x96xf32>
    %171 = math.exp %170 : vector<8x96xf32>
    %cst_29 = arith.constant 1.000000e+00 : f32
    %172 = vector.broadcast %cst_29 : f32 to vector<8x96xf32>
    %173 = arith.addf %172, %171 : vector<8x96xf32>
    %174 = arith.divf %172, %173 : vector<8x96xf32>
    %175 = vector.extract_strided_slice %174 {offsets = [0, 0], sizes = [8, 32], strides = [1, 1]} : vector<8x96xf32> to vector<8x32xf32>
    %176 = vector.extract_strided_slice %174 {offsets = [0, 32], sizes = [8, 32], strides = [1, 1]} : vector<8x96xf32> to vector<8x32xf32>
    %177 = vector.extract_strided_slice %174 {offsets = [0, 64], sizes = [8, 32], strides = [1, 1]} : vector<8x96xf32> to vector<8x32xf32>
    %178 = vector.extract_strided_slice %168 {offsets = [0, 96], sizes = [8, 32], strides = [1, 1]} : vector<8x128xf32> to vector<8x32xf32>
    %179 = math.tanh %178 : vector<8x32xf32>
    %180 = arith.mulf %176, %143 : vector<8x32xf32>
    %181 = arith.mulf %175, %179 : vector<8x32xf32>
    %182 = arith.addf %180, %181 : vector<8x32xf32>
    %183 = math.tanh %182 : vector<8x32xf32>
    %184 = arith.mulf %177, %183 : vector<8x32xf32>
    %185 = tpu.concatenate %184, %165 in 1 : vector<8x32xf32>, vector<8x32xf32> -> vector<8x64xf32>
    %cst_30 = arith.constant dense<0.000000e+00> : vector<8x128xf32>
    %186 = tpu.matmul %185, %7, %cst_30 {dimension_numbers = #tpu.dot_dimension_numbers<[1], [0], [0], [1], [0, 0, 1, 1], [], []>} : vector<8x64xf32>, vector<64x128xf32>, vector<8x128xf32> -> vector<8x128xf32>
    %187 = vector.broadcast %8 : vector<1x128xf32> to vector<8x128xf32>
    %188 = arith.addf %186, %187 : vector<8x128xf32>
    %189 = vector.extract_strided_slice %188 {offsets = [0, 0], sizes = [8, 96], strides = [1, 1]} : vector<8x128xf32> to vector<8x96xf32>
    %190 = arith.negf %189 : vector<8x96xf32>
    %191 = math.exp %190 : vector<8x96xf32>
    %cst_31 = arith.constant 1.000000e+00 : f32
    %192 = vector.broadcast %cst_31 : f32 to vector<8x96xf32>
    %193 = arith.addf %192, %191 : vector<8x96xf32>
    %194 = arith.divf %192, %193 : vector<8x96xf32>
    %195 = vector.extract_strided_slice %194 {offsets = [0, 0], sizes = [8, 32], strides = [1, 1]} : vector<8x96xf32> to vector<8x32xf32>
    %196 = vector.extract_strided_slice %194 {offsets = [0, 32], sizes = [8, 32], strides = [1, 1]} : vector<8x96xf32> to vector<8x32xf32>
    %197 = vector.extract_strided_slice %194 {offsets = [0, 64], sizes = [8, 32], strides = [1, 1]} : vector<8x96xf32> to vector<8x32xf32>
    %198 = vector.extract_strided_slice %188 {offsets = [0, 96], sizes = [8, 32], strides = [1, 1]} : vector<8x128xf32> to vector<8x32xf32>
    %199 = math.tanh %198 : vector<8x32xf32>
    %200 = arith.mulf %196, %163 : vector<8x32xf32>
    %201 = arith.mulf %195, %199 : vector<8x32xf32>
    %202 = arith.addf %200, %201 : vector<8x32xf32>
    %203 = math.tanh %202 : vector<8x32xf32>
    %204 = arith.mulf %197, %203 : vector<8x32xf32>
    %205 = vector.extract_strided_slice %5 {offsets = [40, 0], sizes = [8, 128], strides = [1, 1]} : vector<64x128xf32> to vector<8x128xf32>
    %cst_32 = arith.constant dense<0.000000e+00> : vector<8x128xf32>
    %206 = tpu.matmul %184, %6, %cst_32 {dimension_numbers = #tpu.dot_dimension_numbers<[1], [0], [0], [1], [0, 0, 1, 1], [], []>} : vector<8x32xf32>, vector<32x128xf32>, vector<8x128xf32> -> vector<8x128xf32>
    %207 = arith.addf %205, %206 : vector<8x128xf32>
    %208 = vector.extract_strided_slice %207 {offsets = [0, 0], sizes = [8, 96], strides = [1, 1]} : vector<8x128xf32> to vector<8x96xf32>
    %209 = arith.negf %208 : vector<8x96xf32>
    %210 = math.exp %209 : vector<8x96xf32>
    %cst_33 = arith.constant 1.000000e+00 : f32
    %211 = vector.broadcast %cst_33 : f32 to vector<8x96xf32>
    %212 = arith.addf %211, %210 : vector<8x96xf32>
    %213 = arith.divf %211, %212 : vector<8x96xf32>
    %214 = vector.extract_strided_slice %213 {offsets = [0, 0], sizes = [8, 32], strides = [1, 1]} : vector<8x96xf32> to vector<8x32xf32>
    %215 = vector.extract_strided_slice %213 {offsets = [0, 32], sizes = [8, 32], strides = [1, 1]} : vector<8x96xf32> to vector<8x32xf32>
    %216 = vector.extract_strided_slice %213 {offsets = [0, 64], sizes = [8, 32], strides = [1, 1]} : vector<8x96xf32> to vector<8x32xf32>
    %217 = vector.extract_strided_slice %207 {offsets = [0, 96], sizes = [8, 32], strides = [1, 1]} : vector<8x128xf32> to vector<8x32xf32>
    %218 = math.tanh %217 : vector<8x32xf32>
    %219 = arith.mulf %215, %182 : vector<8x32xf32>
    %220 = arith.mulf %214, %218 : vector<8x32xf32>
    %221 = arith.addf %219, %220 : vector<8x32xf32>
    %222 = math.tanh %221 : vector<8x32xf32>
    %223 = arith.mulf %216, %222 : vector<8x32xf32>
    %224 = tpu.concatenate %223, %204 in 1 : vector<8x32xf32>, vector<8x32xf32> -> vector<8x64xf32>
    %cst_34 = arith.constant dense<0.000000e+00> : vector<8x128xf32>
    %225 = tpu.matmul %224, %7, %cst_34 {dimension_numbers = #tpu.dot_dimension_numbers<[1], [0], [0], [1], [0, 0, 1, 1], [], []>} : vector<8x64xf32>, vector<64x128xf32>, vector<8x128xf32> -> vector<8x128xf32>
    %226 = vector.broadcast %8 : vector<1x128xf32> to vector<8x128xf32>
    %227 = arith.addf %225, %226 : vector<8x128xf32>
    %228 = vector.extract_strided_slice %227 {offsets = [0, 0], sizes = [8, 96], strides = [1, 1]} : vector<8x128xf32> to vector<8x96xf32>
    %229 = arith.negf %228 : vector<8x96xf32>
    %230 = math.exp %229 : vector<8x96xf32>
    %cst_35 = arith.constant 1.000000e+00 : f32
    %231 = vector.broadcast %cst_35 : f32 to vector<8x96xf32>
    %232 = arith.addf %231, %230 : vector<8x96xf32>
    %233 = arith.divf %231, %232 : vector<8x96xf32>
    %234 = vector.extract_strided_slice %233 {offsets = [0, 0], sizes = [8, 32], strides = [1, 1]} : vector<8x96xf32> to vector<8x32xf32>
    %235 = vector.extract_strided_slice %233 {offsets = [0, 32], sizes = [8, 32], strides = [1, 1]} : vector<8x96xf32> to vector<8x32xf32>
    %236 = vector.extract_strided_slice %233 {offsets = [0, 64], sizes = [8, 32], strides = [1, 1]} : vector<8x96xf32> to vector<8x32xf32>
    %237 = vector.extract_strided_slice %227 {offsets = [0, 96], sizes = [8, 32], strides = [1, 1]} : vector<8x128xf32> to vector<8x32xf32>
    %238 = math.tanh %237 : vector<8x32xf32>
    %239 = arith.mulf %235, %202 : vector<8x32xf32>
    %240 = arith.mulf %234, %238 : vector<8x32xf32>
    %241 = arith.addf %239, %240 : vector<8x32xf32>
    %242 = math.tanh %241 : vector<8x32xf32>
    %243 = arith.mulf %236, %242 : vector<8x32xf32>
    %244 = vector.extract_strided_slice %5 {offsets = [48, 0], sizes = [8, 128], strides = [1, 1]} : vector<64x128xf32> to vector<8x128xf32>
    %cst_36 = arith.constant dense<0.000000e+00> : vector<8x128xf32>
    %245 = tpu.matmul %223, %6, %cst_36 {dimension_numbers = #tpu.dot_dimension_numbers<[1], [0], [0], [1], [0, 0, 1, 1], [], []>} : vector<8x32xf32>, vector<32x128xf32>, vector<8x128xf32> -> vector<8x128xf32>
    %246 = arith.addf %244, %245 : vector<8x128xf32>
    %247 = vector.extract_strided_slice %246 {offsets = [0, 0], sizes = [8, 96], strides = [1, 1]} : vector<8x128xf32> to vector<8x96xf32>
    %248 = arith.negf %247 : vector<8x96xf32>
    %249 = math.exp %248 : vector<8x96xf32>
    %cst_37 = arith.constant 1.000000e+00 : f32
    %250 = vector.broadcast %cst_37 : f32 to vector<8x96xf32>
    %251 = arith.addf %250, %249 : vector<8x96xf32>
    %252 = arith.divf %250, %251 : vector<8x96xf32>
    %253 = vector.extract_strided_slice %252 {offsets = [0, 0], sizes = [8, 32], strides = [1, 1]} : vector<8x96xf32> to vector<8x32xf32>
    %254 = vector.extract_strided_slice %252 {offsets = [0, 32], sizes = [8, 32], strides = [1, 1]} : vector<8x96xf32> to vector<8x32xf32>
    %255 = vector.extract_strided_slice %252 {offsets = [0, 64], sizes = [8, 32], strides = [1, 1]} : vector<8x96xf32> to vector<8x32xf32>
    %256 = vector.extract_strided_slice %246 {offsets = [0, 96], sizes = [8, 32], strides = [1, 1]} : vector<8x128xf32> to vector<8x32xf32>
    %257 = math.tanh %256 : vector<8x32xf32>
    %258 = arith.mulf %254, %221 : vector<8x32xf32>
    %259 = arith.mulf %253, %257 : vector<8x32xf32>
    %260 = arith.addf %258, %259 : vector<8x32xf32>
    %261 = math.tanh %260 : vector<8x32xf32>
    %262 = arith.mulf %255, %261 : vector<8x32xf32>
    %263 = tpu.concatenate %262, %243 in 1 : vector<8x32xf32>, vector<8x32xf32> -> vector<8x64xf32>
    %cst_38 = arith.constant dense<0.000000e+00> : vector<8x128xf32>
    %264 = tpu.matmul %263, %7, %cst_38 {dimension_numbers = #tpu.dot_dimension_numbers<[1], [0], [0], [1], [0, 0, 1, 1], [], []>} : vector<8x64xf32>, vector<64x128xf32>, vector<8x128xf32> -> vector<8x128xf32>
    %265 = vector.broadcast %8 : vector<1x128xf32> to vector<8x128xf32>
    %266 = arith.addf %264, %265 : vector<8x128xf32>
    %267 = vector.extract_strided_slice %266 {offsets = [0, 0], sizes = [8, 96], strides = [1, 1]} : vector<8x128xf32> to vector<8x96xf32>
    %268 = arith.negf %267 : vector<8x96xf32>
    %269 = math.exp %268 : vector<8x96xf32>
    %cst_39 = arith.constant 1.000000e+00 : f32
    %270 = vector.broadcast %cst_39 : f32 to vector<8x96xf32>
    %271 = arith.addf %270, %269 : vector<8x96xf32>
    %272 = arith.divf %270, %271 : vector<8x96xf32>
    %273 = vector.extract_strided_slice %272 {offsets = [0, 0], sizes = [8, 32], strides = [1, 1]} : vector<8x96xf32> to vector<8x32xf32>
    %274 = vector.extract_strided_slice %272 {offsets = [0, 32], sizes = [8, 32], strides = [1, 1]} : vector<8x96xf32> to vector<8x32xf32>
    %275 = vector.extract_strided_slice %272 {offsets = [0, 64], sizes = [8, 32], strides = [1, 1]} : vector<8x96xf32> to vector<8x32xf32>
    %276 = vector.extract_strided_slice %266 {offsets = [0, 96], sizes = [8, 32], strides = [1, 1]} : vector<8x128xf32> to vector<8x32xf32>
    %277 = math.tanh %276 : vector<8x32xf32>
    %278 = arith.mulf %274, %241 : vector<8x32xf32>
    %279 = arith.mulf %273, %277 : vector<8x32xf32>
    %280 = arith.addf %278, %279 : vector<8x32xf32>
    %281 = math.tanh %280 : vector<8x32xf32>
    %282 = arith.mulf %275, %281 : vector<8x32xf32>
    %283 = vector.extract_strided_slice %5 {offsets = [56, 0], sizes = [8, 128], strides = [1, 1]} : vector<64x128xf32> to vector<8x128xf32>
    %cst_40 = arith.constant dense<0.000000e+00> : vector<8x128xf32>
    %284 = tpu.matmul %262, %6, %cst_40 {dimension_numbers = #tpu.dot_dimension_numbers<[1], [0], [0], [1], [0, 0, 1, 1], [], []>} : vector<8x32xf32>, vector<32x128xf32>, vector<8x128xf32> -> vector<8x128xf32>
    %285 = arith.addf %283, %284 : vector<8x128xf32>
    %286 = vector.extract_strided_slice %285 {offsets = [0, 0], sizes = [8, 96], strides = [1, 1]} : vector<8x128xf32> to vector<8x96xf32>
    %287 = arith.negf %286 : vector<8x96xf32>
    %288 = math.exp %287 : vector<8x96xf32>
    %cst_41 = arith.constant 1.000000e+00 : f32
    %289 = vector.broadcast %cst_41 : f32 to vector<8x96xf32>
    %290 = arith.addf %289, %288 : vector<8x96xf32>
    %291 = arith.divf %289, %290 : vector<8x96xf32>
    %292 = vector.extract_strided_slice %291 {offsets = [0, 0], sizes = [8, 32], strides = [1, 1]} : vector<8x96xf32> to vector<8x32xf32>
    %293 = vector.extract_strided_slice %291 {offsets = [0, 32], sizes = [8, 32], strides = [1, 1]} : vector<8x96xf32> to vector<8x32xf32>
    %294 = vector.extract_strided_slice %291 {offsets = [0, 64], sizes = [8, 32], strides = [1, 1]} : vector<8x96xf32> to vector<8x32xf32>
    %295 = vector.extract_strided_slice %285 {offsets = [0, 96], sizes = [8, 32], strides = [1, 1]} : vector<8x128xf32> to vector<8x32xf32>
    %296 = math.tanh %295 : vector<8x32xf32>
    %297 = arith.mulf %293, %260 : vector<8x32xf32>
    %298 = arith.mulf %292, %296 : vector<8x32xf32>
    %299 = arith.addf %297, %298 : vector<8x32xf32>
    %300 = math.tanh %299 : vector<8x32xf32>
    %301 = arith.mulf %294, %300 : vector<8x32xf32>
    %302 = tpu.concatenate %301, %282 in 1 : vector<8x32xf32>, vector<8x32xf32> -> vector<8x64xf32>
    %cst_42 = arith.constant dense<0.000000e+00> : vector<8x128xf32>
    %303 = tpu.matmul %302, %7, %cst_42 {dimension_numbers = #tpu.dot_dimension_numbers<[1], [0], [0], [1], [0, 0, 1, 1], [], []>} : vector<8x64xf32>, vector<64x128xf32>, vector<8x128xf32> -> vector<8x128xf32>
    %304 = vector.broadcast %8 : vector<1x128xf32> to vector<8x128xf32>
    %305 = arith.addf %303, %304 : vector<8x128xf32>
    %306 = vector.extract_strided_slice %305 {offsets = [0, 0], sizes = [8, 96], strides = [1, 1]} : vector<8x128xf32> to vector<8x96xf32>
    %307 = arith.negf %306 : vector<8x96xf32>
    %308 = math.exp %307 : vector<8x96xf32>
    %cst_43 = arith.constant 1.000000e+00 : f32
    %309 = vector.broadcast %cst_43 : f32 to vector<8x96xf32>
    %310 = arith.addf %309, %308 : vector<8x96xf32>
    %311 = arith.divf %309, %310 : vector<8x96xf32>
    %312 = vector.extract_strided_slice %311 {offsets = [0, 0], sizes = [8, 32], strides = [1, 1]} : vector<8x96xf32> to vector<8x32xf32>
    %313 = vector.extract_strided_slice %311 {offsets = [0, 32], sizes = [8, 32], strides = [1, 1]} : vector<8x96xf32> to vector<8x32xf32>
    %314 = vector.extract_strided_slice %311 {offsets = [0, 64], sizes = [8, 32], strides = [1, 1]} : vector<8x96xf32> to vector<8x32xf32>
    %315 = vector.extract_strided_slice %305 {offsets = [0, 96], sizes = [8, 32], strides = [1, 1]} : vector<8x128xf32> to vector<8x32xf32>
    %316 = math.tanh %315 : vector<8x32xf32>
    %317 = arith.mulf %313, %280 : vector<8x32xf32>
    %318 = arith.mulf %312, %316 : vector<8x32xf32>
    %319 = arith.addf %317, %318 : vector<8x32xf32>
    %320 = math.tanh %319 : vector<8x32xf32>
    %321 = arith.mulf %314, %320 : vector<8x32xf32>
    %322 = tpu.concatenate %48, %87, %126, %165, %204, %243, %282, %321 in 0 : vector<8x32xf32>, vector<8x32xf32>, vector<8x32xf32>, vector<8x32xf32>, vector<8x32xf32>, vector<8x32xf32>, vector<8x32xf32>, vector<8x32xf32> -> vector<64x32xf32>
    %c0_44 = arith.constant 0 : index
    %c0_45 = arith.constant 0 : index
    %323 = vector.load %arg6[%c0_44, %c0_45] : memref<32x32xf32, #tpu.memory_space<vmem>>, vector<32x32xf32>
    %cst_46 = arith.constant dense<0.000000e+00> : vector<64x32xf32>
    %324 = tpu.matmul %322, %323, %cst_46 {dimension_numbers = #tpu.dot_dimension_numbers<[1], [0], [0], [1], [0, 0, 1, 1], [], []>} : vector<64x32xf32>, vector<32x32xf32>, vector<64x32xf32> -> vector<64x32xf32>
    %325 = math.tanh %324 : vector<64x32xf32>
    %c0_47 = arith.constant 0 : index
    %c0_48 = arith.constant 0 : index
    %326 = vector.load %arg7[%c0_47, %c0_48] : memref<1x32xf32, #tpu.memory_space<vmem>>, vector<1x32xf32>
    %327 = vector.broadcast %326 : vector<1x32xf32> to vector<64x32xf32>
    %328 = arith.mulf %325, %327 : vector<64x32xf32>
    %cst_49 = arith.constant dense<0.000000e+00> : vector<64xf32>
    %329 = vector.multi_reduction <add>, %328, %cst_49 [1] : vector<64x32xf32> to vector<64xf32>
    %330 = vector.shape_cast %329 : vector<64xf32> to vector<64x1xf32>
    %331 = vector.extract_strided_slice %330 {offsets = [0, 0], sizes = [8, 1], strides = [1, 1]} : vector<64x1xf32> to vector<8x1xf32>
    %332 = vector.extract_strided_slice %330 {offsets = [8, 0], sizes = [8, 1], strides = [1, 1]} : vector<64x1xf32> to vector<8x1xf32>
    %333 = vector.extract_strided_slice %330 {offsets = [16, 0], sizes = [8, 1], strides = [1, 1]} : vector<64x1xf32> to vector<8x1xf32>
    %334 = vector.extract_strided_slice %330 {offsets = [24, 0], sizes = [8, 1], strides = [1, 1]} : vector<64x1xf32> to vector<8x1xf32>
    %335 = vector.extract_strided_slice %330 {offsets = [32, 0], sizes = [8, 1], strides = [1, 1]} : vector<64x1xf32> to vector<8x1xf32>
    %336 = vector.extract_strided_slice %330 {offsets = [40, 0], sizes = [8, 1], strides = [1, 1]} : vector<64x1xf32> to vector<8x1xf32>
    %337 = vector.extract_strided_slice %330 {offsets = [48, 0], sizes = [8, 1], strides = [1, 1]} : vector<64x1xf32> to vector<8x1xf32>
    %338 = vector.extract_strided_slice %330 {offsets = [56, 0], sizes = [8, 1], strides = [1, 1]} : vector<64x1xf32> to vector<8x1xf32>
    %339 = tpu.concatenate %331, %332, %333, %334, %335, %336, %337, %338 in 1 : vector<8x1xf32>, vector<8x1xf32>, vector<8x1xf32>, vector<8x1xf32>, vector<8x1xf32>, vector<8x1xf32>, vector<8x1xf32>, vector<8x1xf32> -> vector<8x8xf32>
    %cst_50 = arith.constant dense<0xFF800000> : vector<8xf32>
    %340 = vector.multi_reduction <maximumf>, %339, %cst_50 [1] : vector<8x8xf32> to vector<8xf32>
    %341 = vector.shape_cast %340 : vector<8xf32> to vector<8x1xf32>
    %342 = vector.broadcast %341 : vector<8x1xf32> to vector<8x8xf32>
    %343 = arith.subf %339, %342 : vector<8x8xf32>
    %344 = math.exp %343 : vector<8x8xf32>
    %cst_51 = arith.constant dense<0.000000e+00> : vector<8xf32>
    %345 = vector.multi_reduction <add>, %344, %cst_51 [1] : vector<8x8xf32> to vector<8xf32>
    %346 = vector.shape_cast %345 : vector<8xf32> to vector<8x1xf32>
    %347 = vector.broadcast %346 : vector<8x1xf32> to vector<8x8xf32>
    %348 = arith.divf %344, %347 : vector<8x8xf32>
    %349 = vector.extract_strided_slice %348 {offsets = [0, 0], sizes = [8, 1], strides = [1, 1]} : vector<8x8xf32> to vector<8x1xf32>
    %350 = vector.broadcast %349 : vector<8x1xf32> to vector<8x32xf32>
    %351 = arith.mulf %48, %350 : vector<8x32xf32>
    %352 = vector.extract_strided_slice %348 {offsets = [0, 1], sizes = [8, 1], strides = [1, 1]} : vector<8x8xf32> to vector<8x1xf32>
    %353 = vector.broadcast %352 : vector<8x1xf32> to vector<8x32xf32>
    %354 = arith.mulf %87, %353 : vector<8x32xf32>
    %355 = arith.addf %351, %354 : vector<8x32xf32>
    %356 = vector.extract_strided_slice %348 {offsets = [0, 2], sizes = [8, 1], strides = [1, 1]} : vector<8x8xf32> to vector<8x1xf32>
    %357 = vector.broadcast %356 : vector<8x1xf32> to vector<8x32xf32>
    %358 = arith.mulf %126, %357 : vector<8x32xf32>
    %359 = arith.addf %355, %358 : vector<8x32xf32>
    %360 = vector.extract_strided_slice %348 {offsets = [0, 3], sizes = [8, 1], strides = [1, 1]} : vector<8x8xf32> to vector<8x1xf32>
    %361 = vector.broadcast %360 : vector<8x1xf32> to vector<8x32xf32>
    %362 = arith.mulf %165, %361 : vector<8x32xf32>
    %363 = arith.addf %359, %362 : vector<8x32xf32>
    %364 = vector.extract_strided_slice %348 {offsets = [0, 4], sizes = [8, 1], strides = [1, 1]} : vector<8x8xf32> to vector<8x1xf32>
    %365 = vector.broadcast %364 : vector<8x1xf32> to vector<8x32xf32>
    %366 = arith.mulf %204, %365 : vector<8x32xf32>
    %367 = arith.addf %363, %366 : vector<8x32xf32>
    %368 = vector.extract_strided_slice %348 {offsets = [0, 5], sizes = [8, 1], strides = [1, 1]} : vector<8x8xf32> to vector<8x1xf32>
    %369 = vector.broadcast %368 : vector<8x1xf32> to vector<8x32xf32>
    %370 = arith.mulf %243, %369 : vector<8x32xf32>
    %371 = arith.addf %367, %370 : vector<8x32xf32>
    %372 = vector.extract_strided_slice %348 {offsets = [0, 6], sizes = [8, 1], strides = [1, 1]} : vector<8x8xf32> to vector<8x1xf32>
    %373 = vector.broadcast %372 : vector<8x1xf32> to vector<8x32xf32>
    %374 = arith.mulf %282, %373 : vector<8x32xf32>
    %375 = arith.addf %371, %374 : vector<8x32xf32>
    %376 = vector.extract_strided_slice %348 {offsets = [0, 7], sizes = [8, 1], strides = [1, 1]} : vector<8x8xf32> to vector<8x1xf32>
    %377 = vector.broadcast %376 : vector<8x1xf32> to vector<8x32xf32>
    %378 = arith.mulf %321, %377 : vector<8x32xf32>
    %379 = arith.addf %375, %378 : vector<8x32xf32>
    %c0_52 = arith.constant 0 : index
    %c0_53 = arith.constant 0 : index
    %380 = vector.load %arg8[%c0_52, %c0_53] : memref<32x2xf32, #tpu.memory_space<vmem>>, vector<32x2xf32>
    %cst_54 = arith.constant dense<0.000000e+00> : vector<8x2xf32>
    %381 = tpu.matmul %379, %380, %cst_54 {dimension_numbers = #tpu.dot_dimension_numbers<[1], [0], [0], [1], [0, 0, 1, 1], [], []>} : vector<8x32xf32>, vector<32x2xf32>, vector<8x2xf32> -> vector<8x2xf32>
    %c0_55 = arith.constant 0 : index
    %c0_56 = arith.constant 0 : index
    %382 = vector.load %arg9[%c0_55, %c0_56] : memref<1x2xf32, #tpu.memory_space<vmem>>, vector<1x2xf32>
    %383 = vector.broadcast %382 : vector<1x2xf32> to vector<8x2xf32>
    %384 = arith.addf %381, %383 : vector<8x2xf32>
    %385 = math.tanh %384 : vector<8x2xf32>
    %c0_57 = arith.constant 0 : index
    %c0_58 = arith.constant 0 : index
    %386 = vector.load %arg10[%c0_57, %c0_58] : memref<8x2xf32, #tpu.memory_space<vmem>>, vector<8x2xf32>
    tpu.vector_store %arg10[%c0_57, %c0_58], %385 {strides = array<i32>} : memref<8x2xf32, #tpu.memory_space<vmem>>, vector<8x2xf32>,
    return
  }
}

</mosaic_0001>

<bundles_post_ra>
// kernel: alstm_forward.1
= control target key start
LH: loop header
LB: loop body
LE: loop exit
PB: predicated region body
PF: predicated region fallthrough
CT: control target
= control target key end

     0   :  { %vm49_vm0 = vcmask 130048   ;;  %v1639_v7 = vmov 0.0   ;;  %s1640_s27 = smov 32   ;;  %s1641_s22 = smov 64   ;;  %vm128_vm5 = vcmask 261120   ;;  %vm198_vm6 = vcmask 523264   ;;  %s2174_s2 = inlined_call_operand.vmem [shape: f32[32,128], index: 2, kind: input, shape index: {}]   ;;  %s2175_s1 = inlined_call_operand.vmem [shape: f32[16,128], index: 1, kind: input, shape index: {}]   ;;  %s2176_s0 = inlined_call_operand.vmem [shape: f32[64,16], index: 0, kind: input, shape index: {}]   ;;  %s2177_s3 = inlined_call_operand.vmem [shape: f32[1,128], index: 3, kind: input, shape index: {}]   ;;  %s2178_s4 = inlined_call_operand.vmem [shape: f32[64,128], index: 4, kind: input, shape index: {}]   ;;  %s2179_s5 = inlined_call_operand.vmem [shape: f32[1,128], index: 5, kind: input, shape index: {}]   ;;  %s2180_s6 = inlined_call_operand.vmem [shape: f32[32,32], index: 6, kind: input, shape index: {}]   ;;  %s2181_s7 = inlined_call_operand.vmem [shape: f32[1,32], index: 7, kind: input, shape index: {}]   ;;  %s2182_s8 = inlined_call_operand.vmem [shape: f32[32,2], index: 8, kind: input, shape index: {}]   ;;  %s2183_s9 = inlined_call_operand.vmem [shape: f32[1,2], index: 9, kind: input, shape index: {}]   ;;  %s2184_s10 = inlined_call_operand.vmem [shape: f32[8,2], index: 10, kind: output, shape index: {}]  }
   0x1   :  { %v1709_v0 = vld [vmem:[%s2174_s2 + $0x18] sm:$0xff]  ;;  %v44_v1 = vld [vmem:[%s2175_s1 + $0x8] sm:$0xff]  ;;  %v1717_v2 = vld [vmem:[%s2174_s2 + $0x10] sm:$0xff] }
   0x2   :  { %144 = vmatpush.msra.mxu1 %v1709_v0  ;;  %88 = vmatpush.msra.mxu0 %v44_v1  ;;  %v43_v3 = vld [vmem:[%s2175_s1] sm:$0xff]  ;;  %v1729_v5 = vld [vmem:[%s2174_s2 + $0x8] sm:$0xff]  ;;  %v1763_v33 = vld [vmem:[%s2178_s4 + $0x38] sm:$0xff] }
   0x3   :  { %v35_v4 = vld [vmem:[%s2176_s0] sm:$0xff]  ;;  %273 = vmatpush.msra.mxu3 %v1709_v0  ;;  %v1768_v34 = vld [vmem:[%s2178_s4 + $0x30] sm:$0xff]  ;;  %210 = vmatpush.msra.mxu2 %v1763_v33  ;;  %v1775_v35 = vld [vmem:[%s2178_s4 + $0x28] sm:$0xff] }
   0x4   :  { %145 = vmatpush.msra.mxu1 %v1717_v2  ;;  %89 = vmatpush.msra.mxu0 %v43_v3  ;;  %v1737_v6 = vld [vmem:[%s2174_s2] sm:$0xff]  ;;  %v1791_v37 = vld [vmem:[%s2178_s4 + $0x18] sm:$0xff]  ;;  %v1799_v38 = vld [vmem:[%s2178_s4 + $0x10] sm:$0xff]  ;;  %s1642_s2 = smov 96  }
   0x5   :  { %1410 = vmatmul.msk.f32.vlgmr.msra.gmra.mxu0 %vm49_vm0, %v35_v4  ;;  %274 = vmatpush.msra.mxu3 %v1717_v2  ;;  %v1751_v8 = vld [vmem:[%s2177_s3] ss:$0 sm:$0xff]  ;;  %v1807_v39 = vld [vmem:[%s2178_s4 + $0x8] sm:$0xff] }
   0x6   :  { %146 = vmatpush.msra.mxu1 %v1729_v5  ;;  %1113 = vmatpush.msrb.mxu0 %v1763_v33  ;;  %v1783_v36 = vld [vmem:[%s2178_s4 + $0x20] sm:$0xff]  ;;  %v36_v43 = vld [vmem:[%s2176_s0 + $0x8] sm:$0xff] }
   0x7   :  { %275 = vmatpush.msra.mxu3 %v1729_v5  ;;  %211 = vmatpush.msra.mxu2 %v1768_v34  ;;  %v1820_v42 = vld [vmem:[%s2178_s4] sm:$0xff] }
   0x8   :  { %147 = vmatpush.msra.mxu1 %v1737_v6  ;;  %1114 = vmatpush.msrb.mxu0 %v1768_v34  ;;  %v1855_v46 = vld [vmem:[%s2179_s5] ss:$0 sm:$0xff] }
   0x9   :  { %148 = vmatmul.f32.vlgmr.msra.gmra.mxu1 %v1639_v7  ;;  %276 = vmatpush.msra.mxu3 %v1737_v6 }
   0xa   :  { %855 = vmatpush.msrb.mxu1 %v1763_v33  ;;  %212 = vmatpush.msra.mxu2 %v1775_v35 }
   0xb   :  { %402 = vmatpush.msrb.mxu3 %v1709_v0  ;;  %1115 = vmatpush.msrb.mxu0 %v1775_v35 }
   0xc   :  { %856 = vmatpush.msrb.mxu1 %v1768_v34  ;;  %213 = vmatpush.msra.mxu2 %v1783_v36 }
   0xd   :  { %403 = vmatpush.msrb.mxu3 %v1717_v2  ;;  %1116 = vmatpush.msrb.mxu0 %v1783_v36 }
   0xe   :  { %857 = vmatpush.msrb.mxu1 %v1775_v35  ;;  %214 = vmatpush.msra.mxu2 %v1791_v37 }
   0xf   :  { %404 = vmatpush.msrb.mxu3 %v1729_v5  ;;  %1117 = vmatpush.msrb.mxu0 %v1791_v37 }
  0x10   :  { %858 = vmatpush.msrb.mxu1 %v1783_v36  ;;  %215 = vmatpush.msra.mxu2 %v1799_v38 }
  0x11   :  { %405 = vmatpush.msrb.mxu3 %v1737_v6  ;;  %1118 = vmatpush.msrb.mxu0 %v1799_v38 }
  0x12   :  { %859 = vmatpush.msrb.mxu1 %v1791_v37  ;;  %216 = vmatpush.msra.mxu2 %v1807_v39 }
  0x13   :  { %1119 = vmatpush.msrb.mxu0 %v1807_v39 }
  0x14   :  { %860 = vmatpush.msrb.mxu1 %v1799_v38  ;;  %217 = vmatpush.msra.mxu2 %v1820_v42 }
  0x15   :  { %1120 = vmatpush.msrb.mxu0 %v1820_v42 }
  0x16   :  { %861 = vmatpush.msrb.mxu1 %v1807_v39  ;;  %339 = vmatpush.msrb.mxu2 %v1763_v33 }
  0x17   :  { %1411 = vmatmul.msk.f32.gmra.mxu0 %vm49_vm0, %v36_v43 }
  0x18   :  { %862 = vmatpush.msrb.mxu1 %v1820_v42  ;;  %340 = vmatpush.msrb.mxu2 %v1768_v34 }
  0x1a   :  { %341 = vmatpush.msrb.mxu2 %v1775_v35 }
  0x1c   :  { %342 = vmatpush.msrb.mxu2 %v1783_v36 }
  0x1e   :  { %343 = vmatpush.msrb.mxu2 %v1791_v37 }
  0x20   :  { %344 = vmatpush.msrb.mxu2 %v1799_v38 }
  0x22   :  { %345 = vmatpush.msrb.mxu2 %v1807_v39 }
  0x24   :  { %346 = vmatpush.msrb.mxu2 %v1820_v42 }
  0x82   :  { %v91_v9 = vpop.f32.mrf.mxu0 }
  0x83   :  { %v92_v10 = vadd.f32 %v1751_v8, %v91_v9 }
  0x86   :  { %v149_v11 = vpop.f32.mrf.mxu1 }
  0x87   :  { %v152_v12 = vadd.f32 %v149_v11, %v92_v10 }
  0x89   :  { %1487 = vtanh.f32 %v152_v12  ;;  %v1418_v14 = vmul.f32 -1.442695, %v152_v12 }
  0x8b   :  { %1489 = vpow2.f32 %v1418_v14 }
  0x8f   :  { %v1488_v13 = vpop.eup %1487 }
  0x90   :  { %175 = vrot.lane.b32.xlu0 %v1488_v13, %s1640_s27 }
  0x91   :  { %v1490_v15 = vpop.eup %1489 }
  0x92   :  { %v156_v16 = vadd.f32 1.0, %v1490_v15 }
  0x94   :  { %1491 = vrcp.f32 %v156_v16  ;;  %v168_v22 = vand.u32 2147483648, %v156_v16  ;;  %vm162_vm2 = vweird.f32 %v156_v16  ;;  %v166_v23 = vand.u32 2147483647, %v156_v16  ;;  %v94_v47 = vpop.f32.mrf.mxu0 }
  0x95   :  { %v95_v50 = vadd.f32 %v1751_v8, %v94_v47  ;;  %v37_v47 = vld [vmem:[%s2176_s0 + $0x10] sm:$0xff] }
  0x96   :  { %v169_v25 = vor.u32 1.1754944e-38, %v168_v22  ;;  %vm167_vm4 = vcmp.eq.f32.partialorder %v166_v23, 8.507059e+37  ;;  %1412 = vmatmul.msk.f32.gmra.mxu0 %vm49_vm0, %v37_v47 }
  0x9a   :  { %v1492_v17 = vpop.eup %1491 }
  0x9b   :  { %v158_v18 = vmul.f32 %v1492_v17, %v156_v16  ;;  %vm163_vm1 = vweird.f32 %v1492_v17 }
  0x9c   :  { %vm164_vm3 = vmor %vm162_vm2, %vm163_vm1 }
  0x9d   :  { %v159_v19 = vsub.f32 1.0, %v158_v18 }
  0x9f   :  { %v160_v20 = vmul.f32 %v1492_v17, %v159_v19 }
  0xa1   :  { %v161_v21 = vadd.f32 %v1492_v17, %v160_v20 }
  0xa3   :  { %v165_v24 = vsel %vm164_vm3, %v1492_v17, %v161_v21 }
  0xa4   :  { %v170_v27 = vsel %vm167_vm4, %v169_v25, %v165_v24 }
  0xa5   :  { %v173_v29 = vmul.f32 0.0, %v170_v27 }
 0x102   :  { %v176_v26 = vpop.permute.xlu0 %175 }
 0x103   :  { %v178_v28 = vmul.f32 %v176_v26, %v170_v27 }
 0x105   :  { %180 = vrot.lane.b32.xlu0 %v178_v28, %s1640_s27 }
 0x177   :  { %v181_v30 = vpop.permute.xlu0 %180 }
 0x178   :  { %v1756_v31 = vadd.f32 %v181_v30, %v173_v29 }
 0x17a   :  { %1493 = vtanh.f32 %v1756_v31 }
 0x180   :  { %v1494_v32 = vpop.eup %1493 }
 0x181   :  { %186 = vrot.lane.b32.xlu1 %v1494_v32, %s1640_s27 }
 0x1f3   :  { %v187_v40 = vpop.permute.xlu1 %186 }
 0x1f4   :  { %v189_v41 = vmul.f32 %v187_v40, %v170_v27 }
 0x1f6   :  { %191 = vrot.lane.b32.xlu1 %v189_v41, %s1641_s22 }
 0x268   :  { %v192_v44 = vpop.permute.xlu1 %191 }
 0x269   :  { %1421 = vmatmul.msk.f32.vlgmr.msra.gmra.mxu3 %vm128_vm5, %v192_v44  ;;  %v194_v45 = vsel %vm128_vm5, %v192_v44, 0.0 }
 0x26a   :  { %1419 = vmatmul.msk.f32.vlgmr.msra.gmra.mxu2 %vm198_vm6, %v194_v45  ;;  %531 = vmatpush.msra.mxu3 %v1709_v0 }
 0x26b   :  { %468 = vmatpush.msra.mxu2 %v1763_v33 }
 0x26c   :  { %532 = vmatpush.msra.mxu3 %v1717_v2 }
 0x26d   :  { %469 = vmatpush.msra.mxu2 %v1768_v34 }
 0x26e   :  { %533 = vmatpush.msra.mxu3 %v1729_v5 }
 0x26f   :  { %470 = vmatpush.msra.mxu2 %v1775_v35 }
 0x270   :  { %534 = vmatpush.msra.mxu3 %v1737_v6 }
 0x271   :  { %471 = vmatpush.msra.mxu2 %v1783_v36 }
 0x273   :  { %472 = vmatpush.msra.mxu2 %v1791_v37 }
 0x275   :  { %473 = vmatpush.msra.mxu2 %v1799_v38 }
 0x277   :  { %474 = vmatpush.msra.mxu2 %v1807_v39 }
 0x279   :  { %475 = vmatpush.msra.mxu2 %v1820_v42 }
 0x2ec   :  { %v278_v51 = vpop.f32.mrf.mxu3 }
 0x2ed   :  { %v219_v48 = vpop.f32.mrf.mxu2  ;;  %v281_v52 = vadd.f32 %v278_v51, %v95_v50  ;;  %v97_v51 = vpop.f32.mrf.mxu0 }
 0x2ee   :  { %v220_v49 = vadd.f32 %v1855_v46, %v219_v48 }
 0x2ef   :  { %v1422_v56 = vmul.f32 -1.442695, %v281_v52 }
 0x2f0   :  { %1495 = vtanh.f32 %v220_v49  ;;  %v1420_v55 = vmul.f32 -1.442695, %v220_v49 }
 0x2f1   :  { %1497 = vtanh.f32 %v281_v52  ;;  %v98_v52 = vadd.f32 %v1751_v8, %v97_v51 }
 0x2f2   :  { %1499 = vpow2.f32 %v1420_v55 }
 0x2f3   :  { %1501 = vpow2.f32 %v1422_v56 }
 0x2f6   :  { %v1496_v53 = vpop.eup %1495 }
 0x2f7   :  { %244 = vrot.lane.b32.xlu2 %v1496_v53, %s1640_s27  ;;  %v1498_v54 = vpop.eup %1497 }
 0x2f8   :  { %v1500_v57 = vpop.eup %1499 }
 0x2f9   :  { %v225_v58 = vadd.f32 1.0, %v1500_v57  ;;  %v1502_v59 = vpop.eup %1501 }
 0x2fa   :  { %v285_v60 = vadd.f32 1.0, %v1502_v59 }
 0x2fb   :  { %1503 = vrcp.f32 %v225_v58  ;;  %v237_v10 = vand.u32 2147483648, %v225_v58  ;;  %vm231_vm8 = vweird.f32 %v225_v58  ;;  %v235_v11 = vand.u32 2147483647, %v225_v58 }
 0x2fc   :  { %1505 = vrcp.f32 %v285_v60  ;;  %v297_v19 = vand.u32 2147483648, %v285_v60  ;;  %vm291_vm12 = vweird.f32 %v285_v60  ;;  %v295_v20 = vand.u32 2147483647, %v285_v60 }
 0x2fd   :  { %v238_v14 = vor.u32 1.1754944e-38, %v237_v10  ;;  %vm236_vm10 = vcmp.eq.f32.partialorder %v235_v11, 8.507059e+37 }
 0x2fe   :  { %v298_v22 = vor.u32 1.1754944e-38, %v297_v19  ;;  %vm296_vm14 = vcmp.eq.f32.partialorder %v295_v20, 8.507059e+37 }
 0x2ff   :  { %304 = vrot.lane.b32.xlu2 %v1498_v54, %s1640_s27 }
 0x301   :  { %v1504_v61 = vpop.eup %1503 }
 0x302   :  { %v227_v62 = vmul.f32 %v1504_v61, %v225_v58  ;;  %v1506_v1 = vpop.eup %1505  ;;  %vm232_vm7 = vweird.f32 %v1504_v61 }
 0x303   :  { %v287_v4 = vmul.f32 %v1506_v1, %v285_v60  ;;  %vm233_vm9 = vmor %vm231_vm8, %vm232_vm7  ;;  %vm292_vm11 = vweird.f32 %v1506_v1 }
 0x304   :  { %v228_v63 = vsub.f32 1.0, %v227_v62  ;;  %vm293_vm13 = vmor %vm291_vm12, %vm292_vm11 }
 0x305   :  { %v288_v9 = vsub.f32 1.0, %v287_v4 }
 0x306   :  { %v229_v3 = vmul.f32 %v1504_v61, %v228_v63 }
 0x307   :  { %v289_v13 = vmul.f32 %v1506_v1, %v288_v9 }
 0x308   :  { %v230_v7 = vadd.f32 %v1504_v61, %v229_v3 }
 0x309   :  { %v290_v18 = vadd.f32 %v1506_v1, %v289_v13 }
 0x30a   :  { %v234_v12 = vsel %vm233_vm9, %v1504_v61, %v230_v7 }
 0x30b   :  { %v239_v16 = vsel %vm236_vm10, %v238_v14, %v234_v12  ;;  %v294_v21 = vsel %vm293_vm13, %v1506_v1, %v290_v18 }
 0x30c   :  { %v299_v23 = vsel %vm296_vm14, %v298_v22, %v294_v21  ;;  %v242_v26 = vmul.f32 0.0, %v239_v16 }
 0x30d   :  { %v302_v29 = vmul.f32 %v299_v23, %v1756_v31 }
 0x351   :  { %v245_v15 = vpop.permute.xlu2 %244 }
 0x352   :  { %v247_v17 = vmul.f32 %v245_v15, %v239_v16 }
 0x354   :  { %249 = vrot.lane.b32.xlu0 %v247_v17, %s1640_s27 }
 0x359   :  { %v305_v24 = vpop.permute.xlu2 %304 }
 0x35a   :  { %v307_v25 = vmul.f32 %v305_v24, %v299_v23 }
 0x35c   :  { %309 = vrot.lane.b32.xlu1 %v307_v25, %s1640_s27 }
 0x3c6   :  { %v250_v27 = vpop.permute.xlu0 %249 }
 0x3c7   :  { %v1863_v28 = vadd.f32 %v250_v27, %v242_v26 }
 0x3c9   :  { %1507 = vtanh.f32 %v1863_v28 }
 0x3ce   :  { %v310_v30 = vpop.permute.xlu1 %309 }
 0x3cf   :  { %v1508_v32 = vpop.eup %1507  ;;  %v1867_v40 = vadd.f32 %v310_v30, %v302_v29 }
 0x3d0   :  { %255 = vrot.lane.b32.xlu2 %v1508_v32, %s1640_s27 }
 0x3d1   :  { %1509 = vtanh.f32 %v1867_v40 }
 0x3d7   :  { %v1510_v41 = vpop.eup %1509 }
 0x3d8   :  { %315 = vrot.lane.b32.xlu0 %v1510_v41, %s1640_s27 }
 0x42a   :  { %v256_v43 = vpop.permute.xlu2 %255 }
 0x42b   :  { %v1872_v44 = vmul.f32 %v256_v43, %v239_v16 }
 0x42d   :  { %324 = vrot.lane.b32.xlu2 %v1872_v44, %s1642_s2 }
 0x44a   :  { %v316_v45 = vpop.permute.xlu0 %315 }
 0x44b   :  { %v318_v31 = vmul.f32 %v316_v45, %v299_v23 }
 0x44d   :  { %320 = vrot.lane.b32.xlu1 %v318_v31, %s1641_s22 }
 0x487   :  { %v325_v48 = vpop.permute.xlu2 %324 }
 0x4bf   :  { %v321_v49 = vpop.permute.xlu1 %320 }
 0x4c0   :  { %v327_v50 = vsel %vm128_vm5, %v321_v49, %v325_v48  ;;  %1425 = vmatmul.msk.f32.vlgmr.msrb.gmra.mxu3 %vm128_vm5, %v321_v49 }
 0x4c1   :  { %1423 = vmatmul.msk.f32.vlgmr.msrb.gmra.mxu2 %vm198_vm6, %v327_v50  ;;  %597 = vmatpush.msrb.mxu3 %v1763_v33 }
 0x4c2   :  { %726 = vmatpush.msrb.mxu2 %v1763_v33 }
 0x4c3   :  { %598 = vmatpush.msrb.mxu3 %v1768_v34 }
 0x4c4   :  { %727 = vmatpush.msrb.mxu2 %v1768_v34 }
 0x4c5   :  { %599 = vmatpush.msrb.mxu3 %v1775_v35 }
 0x4c6   :  { %728 = vmatpush.msrb.mxu2 %v1775_v35 }
 0x4c7   :  { %600 = vmatpush.msrb.mxu3 %v1783_v36 }
 0x4c8   :  { %729 = vmatpush.msrb.mxu2 %v1783_v36 }
 0x4c9   :  { %601 = vmatpush.msrb.mxu3 %v1791_v37 }
 0x4ca   :  { %730 = vmatpush.msrb.mxu2 %v1791_v37 }
 0x4cb   :  { %602 = vmatpush.msrb.mxu3 %v1799_v38 }
 0x4cc   :  { %731 = vmatpush.msrb.mxu2 %v1799_v38 }
 0x4cd   :  { %603 = vmatpush.msrb.mxu3 %v1807_v39 }
 0x4ce   :  { %732 = vmatpush.msrb.mxu2 %v1807_v39 }
 0x4cf   :  { %604 = vmatpush.msrb.mxu3 %v1820_v42 }
 0x4d0   :  { %733 = vmatpush.msrb.mxu2 %v1820_v42 }
 0x543   :  { %v407_v53 = vpop.f32.mrf.mxu3 }
 0x544   :  { %v410_v54 = vadd.f32 %v407_v53, %v98_v52  ;;  %v348_v55 = vpop.f32.mrf.mxu2 }
 0x545   :  { %v349_v56 = vadd.f32 %v1855_v46, %v348_v55 }
 0x546   :  { %1511 = vtanh.f32 %v410_v54  ;;  %v1426_v59 = vmul.f32 -1.442695, %v410_v54 }
 0x547   :  { %1513 = vtanh.f32 %v349_v56  ;;  %v1424_v60 = vmul.f32 -1.442695, %v349_v56 }
 0x548   :  { %1515 = vpow2.f32 %v1426_v59 }
 0x549   :  { %1517 = vpow2.f32 %v1424_v60 }
 0x54c   :  { %v1512_v57 = vpop.eup %1511 }
 0x54d   :  { %v1514_v58 = vpop.eup %1513  ;;  %433 = vrot.lane.b32.xlu1 %v1512_v57, %s1640_s27 }
 0x54e   :  { %373 = vrot.lane.b32.xlu0 %v1514_v58, %s1640_s27  ;;  %v1516_v61 = vpop.eup %1515 }
 0x54f   :  { %v1518_v62 = vpop.eup %1517  ;;  %v414_v63 = vadd.f32 1.0, %v1516_v61 }
 0x550   :  { %v354_v1 = vadd.f32 1.0, %v1518_v62 }
 0x551   :  { %1519 = vrcp.f32 %v414_v63  ;;  %v426_v15 = vand.u32 2147483648, %v414_v63  ;;  %vm420_vm2 = vweird.f32 %v414_v63  ;;  %v424_v17 = vand.u32 2147483647, %v414_v63 }
 0x552   :  { %1521 = vrcp.f32 %v354_v1  ;;  %v366_v18 = vand.u32 2147483648, %v354_v1  ;;  %vm360_vm4 = vweird.f32 %v354_v1  ;;  %v364_v19 = vand.u32 2147483647, %v354_v1 }
 0x553   :  { %v427_v21 = vor.u32 1.1754944e-38, %v426_v15  ;;  %vm425_vm8 = vcmp.eq.f32.partialorder %v424_v17, 8.507059e+37 }
 0x554   :  { %v367_v23 = vor.u32 1.1754944e-38, %v366_v18  ;;  %vm365_vm9 = vcmp.eq.f32.partialorder %v364_v19, 8.507059e+37 }
 0x557   :  { %v1520_v3 = vpop.eup %1519 }
 0x558   :  { %v1522_v4 = vpop.eup %1521  ;;  %v416_v7 = vmul.f32 %v1520_v3, %v414_v63  ;;  %vm421_vm15 = vweird.f32 %v1520_v3 }
 0x559   :  { %v356_v9 = vmul.f32 %v1522_v4, %v354_v1  ;;  %vm361_vm1 = vweird.f32 %v1522_v4  ;;  %vm422_vm3 = vmor %vm420_vm2, %vm421_vm15 }
 0x55a   :  { %v417_v10 = vsub.f32 1.0, %v416_v7  ;;  %vm362_vm7 = vmor %vm360_vm4, %vm361_vm1 }
 0x55b   :  { %v357_v11 = vsub.f32 1.0, %v356_v9 }
 0x55c   :  { %v418_v12 = vmul.f32 %v1520_v3, %v417_v10 }
 0x55d   :  { %v358_v13 = vmul.f32 %v1522_v4, %v357_v11 }
 0x55e   :  { %v419_v14 = vadd.f32 %v1520_v3, %v418_v12 }
 0x55f   :  { %v359_v16 = vadd.f32 %v1522_v4, %v358_v13 }
 0x560   :  { %v423_v20 = vsel %vm422_vm3, %v1520_v3, %v419_v14 }
 0x561   :  { %v363_v22 = vsel %vm362_vm7, %v1522_v4, %v359_v16  ;;  %v428_v25 = vsel %vm425_vm8, %v427_v21, %v423_v20 }
 0x562   :  { %v368_v29 = vsel %vm365_vm9, %v367_v23, %v363_v22  ;;  %v431_v31 = vmul.f32 %v428_v25, %v1867_v40  ;;  %v38_v40 = vld [vmem:[%s2176_s0 + $0x18] sm:$0xff] }
 0x563   :  { %v371_v32 = vmul.f32 %v368_v29, %v1863_v28  ;;  %1413 = vmatmul.msk.f32.gmra.mxu0 %vm49_vm0, %v38_v40 }
 0x5bf   :  { %v434_v24 = vpop.permute.xlu1 %433 }
 0x5c0   :  { %v436_v26 = vmul.f32 %v434_v24, %v428_v25  ;;  %v374_v27 = vpop.permute.xlu0 %373 }
 0x5c1   :  { %v376_v30 = vmul.f32 %v374_v27, %v368_v29 }
 0x5c2   :  { %438 = vrot.lane.b32.xlu0 %v436_v26, %s1640_s27 }
 0x5c3   :  { %378 = vrot.lane.b32.xlu2 %v376_v30, %s1640_s27 }
 0x5e0   :  { %v100_v56 = vpop.f32.mrf.mxu0 }
 0x61d   :  { %v379_v41 = vpop.permute.xlu2 %378 }
 0x61e   :  { %v1907_v43 = vadd.f32 %v379_v41, %v371_v32 }
 0x620   :  { %1523 = vtanh.f32 %v1907_v43 }
 0x626   :  { %v1524_v45 = vpop.eup %1523 }
 0x627   :  { %384 = vrot.lane.b32.xlu1 %v1524_v45, %s1640_s27 }
 0x634   :  { %v439_v47 = vpop.permute.xlu0 %438 }
 0x635   :  { %v1912_v48 = vadd.f32 %v439_v47, %v431_v31 }
 0x637   :  { %1525 = vtanh.f32 %v1912_v48 }
 0x63d   :  { %v1526_v49 = vpop.eup %1525 }
 0x63e   :  { %444 = vrot.lane.b32.xlu2 %v1526_v49, %s1640_s27 }
 0x698   :  { %v445_v50 = vpop.permute.xlu2 %444 }
 0x699   :  { %v447_v28 = vmul.f32 %v445_v50, %v428_v25  ;;  %v385_v51 = vpop.permute.xlu1 %384 }
 0x69a   :  { %v1916_v52 = vmul.f32 %v385_v51, %v368_v29 }
 0x69b   :  { %449 = vrot.lane.b32.xlu0 %v447_v28, %s1641_s22 }
 0x69c   :  { %453 = vrot.lane.b32.xlu1 %v1916_v52, %s1642_s2 }
 0x70d   :  { %v450_v53 = vpop.permute.xlu0 %449 }
 0x70e   :  { %1429 = vmatmul.msk.f32.vlgmr.msra.gmra.mxu3 %vm128_vm5, %v450_v53  ;;  %v454_v54 = vpop.permute.xlu1 %453 }
 0x70f   :  { %v456_v55 = vsel %vm128_vm5, %v450_v53, %v454_v54  ;;  %660 = vmatpush.msra.mxu3 %v1709_v0 }
 0x710   :  { %1427 = vmatmul.msk.f32.vlgmr.msra.gmra.mxu2 %vm198_vm6, %v456_v55 }
 0x711   :  { %661 = vmatpush.msra.mxu3 %v1717_v2  ;;  %984 = vmatpush.msra.mxu2 %v1763_v33  ;;  %v101_v33 = vadd.f32 %v1751_v8, %v100_v56 }
 0x713   :  { %662 = vmatpush.msra.mxu3 %v1729_v5  ;;  %985 = vmatpush.msra.mxu2 %v1768_v34 }
 0x715   :  { %663 = vmatpush.msra.mxu3 %v1737_v6  ;;  %986 = vmatpush.msra.mxu2 %v1775_v35 }
 0x717   :  { %987 = vmatpush.msra.mxu2 %v1783_v36 }
 0x719   :  { %988 = vmatpush.msra.mxu2 %v1791_v37 }
 0x71b   :  { %989 = vmatpush.msra.mxu2 %v1799_v38 }
 0x71d   :  { %990 = vmatpush.msra.mxu2 %v1807_v39 }
 0x71f   :  { %991 = vmatpush.msra.mxu2 %v1820_v42 }
 0x791   :  { %v536_v57 = vpop.f32.mrf.mxu3 }
 0x792   :  { %v539_v58 = vadd.f32 %v536_v57, %v101_v33 }
 0x793   :  { %v477_v34 = vpop.f32.mrf.mxu2 }
 0x794   :  { %1527 = vtanh.f32 %v539_v58  ;;  %v478_v59 = vadd.f32 %v1855_v46, %v477_v34  ;;  %v1430_v42 = vmul.f32 -1.442695, %v539_v58 }
 0x796   :  { %1529 = vtanh.f32 %v478_v59  ;;  %v1428_v37 = vmul.f32 -1.442695, %v478_v59 }
 0x798   :  { %1531 = vpow2.f32 %v1428_v37 }
 0x79a   :  { %v1528_v35 = vpop.eup %1527 }
 0x79b   :  { %562 = vrot.lane.b32.xlu0 %v1528_v35, %s1640_s27 }
 0x79c   :  { %v1530_v36 = vpop.eup %1529 }
 0x79d   :  { %502 = vrot.lane.b32.xlu2 %v1530_v36, %s1640_s27 }
 0x79e   :  { %v1532_v38 = vpop.eup %1531 }
 0x79f   :  { %v483_v39 = vadd.f32 1.0, %v1532_v38 }
 0x7a1   :  { %1533 = vrcp.f32 %v483_v39  ;;  %v495_v7 = vand.u32 2147483648, %v483_v39  ;;  %vm489_vm11 = vweird.f32 %v483_v39  ;;  %v493_v9 = vand.u32 2147483647, %v483_v39 }
 0x7a2   :  { %1535 = vpow2.f32 %v1430_v42 }
 0x7a3   :  { %v496_v11 = vor.u32 1.1754944e-38, %v495_v7  ;;  %vm494_vm13 = vcmp.eq.f32.partialorder %v493_v9, 8.507059e+37 }
 0x7a7   :  { %v1534_v60 = vpop.eup %1533 }
 0x7a8   :  { %v485_v61 = vmul.f32 %v1534_v60, %v483_v39  ;;  %v1536_v63 = vpop.eup %1535  ;;  %vm490_vm10 = vweird.f32 %v1534_v60 }
 0x7a9   :  { %v543_v1 = vadd.f32 1.0, %v1536_v63  ;;  %vm491_vm12 = vmor %vm489_vm11, %vm490_vm10 }
 0x7aa   :  { %v486_v62 = vsub.f32 1.0, %v485_v61 }
 0x7ab   :  { %1537 = vrcp.f32 %v543_v1  ;;  %v555_v20 = vand.u32 2147483648, %v543_v1  ;;  %vm549_vm15 = vweird.f32 %v543_v1  ;;  %v553_v21 = vand.u32 2147483647, %v543_v1 }
 0x7ac   :  { %v487_v3 = vmul.f32 %v1534_v60, %v486_v62 }
 0x7ad   :  { %v556_v23 = vor.u32 1.1754944e-38, %v555_v20  ;;  %vm554_vm2 = vcmp.eq.f32.partialorder %v553_v21, 8.507059e+37 }
 0x7ae   :  { %v488_v4 = vadd.f32 %v1534_v60, %v487_v3 }
 0x7b0   :  { %v492_v10 = vsel %vm491_vm12, %v1534_v60, %v488_v4 }
 0x7b1   :  { %v1538_v12 = vpop.eup %1537  ;;  %v497_v14 = vsel %vm494_vm13, %v496_v11, %v492_v10 }
 0x7b2   :  { %v545_v16 = vmul.f32 %v1538_v12, %v543_v1  ;;  %vm550_vm14 = vweird.f32 %v1538_v12  ;;  %v500_v32 = vmul.f32 %v497_v14, %v1907_v43  ;;  %v39_v43 = vld [vmem:[%s2176_s0 + $0x20] sm:$0xff] }
 0x7b3   :  { %vm551_vm1 = vmor %vm549_vm15, %vm550_vm14  ;;  %1414 = vmatmul.msk.f32.gmra.mxu0 %vm49_vm0, %v39_v43 }
 0x7b4   :  { %v546_v17 = vsub.f32 1.0, %v545_v16 }
 0x7b6   :  { %v547_v18 = vmul.f32 %v1538_v12, %v546_v17 }
 0x7b8   :  { %v548_v19 = vadd.f32 %v1538_v12, %v547_v18 }
 0x7ba   :  { %v552_v22 = vsel %vm551_vm1, %v1538_v12, %v548_v19 }
 0x7bb   :  { %v557_v25 = vsel %vm554_vm2, %v556_v23, %v552_v22 }
 0x7bc   :  { %v560_v27 = vmul.f32 %v557_v25, %v1912_v48 }
 0x7f7   :  { %v503_v13 = vpop.permute.xlu2 %502 }
 0x7f8   :  { %v505_v15 = vmul.f32 %v503_v13, %v497_v14 }
 0x7fa   :  { %507 = vrot.lane.b32.xlu1 %v505_v15, %s1640_s27 }
 0x80d   :  { %v563_v24 = vpop.permute.xlu0 %562 }
 0x80e   :  { %v565_v26 = vmul.f32 %v563_v24, %v557_v25 }
 0x810   :  { %567 = vrot.lane.b32.xlu2 %v565_v26, %s1640_s27 }
 0x830   :  { %v103_v56 = vpop.f32.mrf.mxu0 }
 0x831   :  { %v104_v33 = vadd.f32 %v1751_v8, %v103_v56 }
 0x86a   :  { %v568_v29 = vpop.permute.xlu2 %567 }
 0x86b   :  { %v1947_v30 = vadd.f32 %v568_v29, %v560_v27 }
 0x86c   :  { %v508_v41 = vpop.permute.xlu1 %507 }
 0x86d   :  { %1539 = vtanh.f32 %v1947_v30  ;;  %v1951_v45 = vadd.f32 %v508_v41, %v500_v32 }
 0x86f   :  { %1541 = vtanh.f32 %v1951_v45 }
 0x873   :  { %v1540_v31 = vpop.eup %1539 }
 0x874   :  { %573 = vrot.lane.b32.xlu1 %v1540_v31, %s1640_s27 }
 0x875   :  { %v1542_v47 = vpop.eup %1541 }
 0x876   :  { %513 = vrot.lane.b32.xlu0 %v1542_v47, %s1640_s27 }
 0x8e6   :  { %v574_v49 = vpop.permute.xlu1 %573 }
 0x8e7   :  { %v576_v48 = vmul.f32 %v574_v49, %v557_v25 }
 0x8e8   :  { %v514_v50 = vpop.permute.xlu0 %513 }
 0x8e9   :  { %578 = vrot.lane.b32.xlu2 %v576_v48, %s1641_s22  ;;  %v1957_v28 = vmul.f32 %v514_v50, %v497_v14 }
 0x8eb   :  { %582 = vrot.lane.b32.xlu0 %v1957_v28, %s1642_s2 }
 0x943   :  { %v579_v51 = vpop.permute.xlu2 %578 }
 0x95d   :  { %v583_v40 = vpop.permute.xlu0 %582 }
 0x95e   :  { %v585_v53 = vsel %vm128_vm5, %v579_v51, %v583_v40 }
 0x95f   :  { %1431 = vmatmul.msk.f32.vlgmr.msrb.gmra.mxu3 %vm198_vm6, %v585_v53 }
 0x960   :  { %789 = vmatpush.msrb.mxu3 %v1709_v0 }
 0x962   :  { %790 = vmatpush.msrb.mxu3 %v1717_v2 }
 0x964   :  { %791 = vmatpush.msrb.mxu3 %v1729_v5 }
 0x966   :  { %792 = vmatpush.msrb.mxu3 %v1737_v6 }
 0x967   :  { %1433 = vmatmul.msk.f32.vlgmr.msra.gmra.mxu3 %vm128_vm5, %v579_v51 }
 0x968   :  { %918 = vmatpush.msra.mxu3 %v1709_v0 }
 0x96a   :  { %919 = vmatpush.msra.mxu3 %v1717_v2 }
 0x96c   :  { %920 = vmatpush.msra.mxu3 %v1729_v5 }
 0x96e   :  { %921 = vmatpush.msra.mxu3 %v1737_v6 }
 0x9e2   :  { %v606_v54 = vpop.f32.mrf.mxu3 }
 0x9e3   :  { %v607_v55 = vadd.f32 %v1855_v46, %v606_v54 }
 0x9e5   :  { %1543 = vtanh.f32 %v607_v55  ;;  %v1432_v35 = vmul.f32 -1.442695, %v607_v55 }
 0x9ea   :  { %v665_v57 = vpop.f32.mrf.mxu3 }
 0x9eb   :  { %v1544_v58 = vpop.eup %1543  ;;  %v668_v34 = vadd.f32 %v665_v57, %v104_v33 }
 0x9ec   :  { %631 = vrot.lane.b32.xlu2 %v1544_v58, %s1640_s27 }
 0x9ed   :  { %1545 = vtanh.f32 %v668_v34  ;;  %v1434_v60 = vmul.f32 -1.442695, %v668_v34 }
 0x9ee   :  { %1547 = vpow2.f32 %v1432_v35 }
 0x9f3   :  { %v1546_v59 = vpop.eup %1545 }
 0x9f4   :  { %691 = vrot.lane.b32.xlu1 %v1546_v59, %s1640_s27  ;;  %v1548_v36 = vpop.eup %1547 }
 0x9f5   :  { %v612_v37 = vadd.f32 1.0, %v1548_v36 }
 0x9f7   :  { %1549 = vrcp.f32 %v612_v37  ;;  %v624_v63 = vand.u32 2147483648, %v612_v37  ;;  %vm618_vm4 = vweird.f32 %v612_v37  ;;  %v622_v1 = vand.u32 2147483647, %v612_v37 }
 0x9f8   :  { %1551 = vpow2.f32 %v1434_v60 }
 0x9f9   :  { %v625_v7 = vor.u32 1.1754944e-38, %v624_v63  ;;  %vm623_vm8 = vcmp.eq.f32.partialorder %v622_v1, 8.507059e+37 }
 0x9fd   :  { %v1550_v38 = vpop.eup %1549 }
 0x9fe   :  { %v614_v39 = vmul.f32 %v1550_v38, %v612_v37  ;;  %vm619_vm3 = vweird.f32 %v1550_v38  ;;  %v1552_v3 = vpop.eup %1551 }
 0x9ff   :  { %vm620_vm7 = vmor %vm618_vm4, %vm619_vm3  ;;  %v672_v9 = vadd.f32 1.0, %v1552_v3 }
 0xa00   :  { %v615_v42 = vsub.f32 1.0, %v614_v39 }
 0xa01   :  { %1553 = vrcp.f32 %v672_v9  ;;  %v684_v18 = vand.u32 2147483648, %v672_v9  ;;  %vm678_vm10 = vweird.f32 %v672_v9  ;;  %v682_v19 = vand.u32 2147483647, %v672_v9 }
 0xa02   :  { %v616_v61 = vmul.f32 %v1550_v38, %v615_v42 }
 0xa03   :  { %v685_v21 = vor.u32 1.1754944e-38, %v684_v18  ;;  %vm683_vm12 = vcmp.eq.f32.partialorder %v682_v19, 8.507059e+37 }
 0xa04   :  { %v617_v62 = vadd.f32 %v1550_v38, %v616_v61 }
 0xa06   :  { %v621_v4 = vsel %vm620_vm7, %v1550_v38, %v617_v62 }
 0xa07   :  { %v626_v11 = vsel %vm623_vm8, %v625_v7, %v621_v4  ;;  %v1554_v13 = vpop.eup %1553 }
 0xa08   :  { %v674_v14 = vmul.f32 %v1554_v13, %v672_v9  ;;  %vm679_vm9 = vweird.f32 %v1554_v13  ;;  %v629_v25 = vmul.f32 %v626_v11, %v1951_v45 }
 0xa09   :  { %vm680_vm11 = vmor %vm678_vm10, %vm679_vm9 }
 0xa0a   :  { %v675_v15 = vsub.f32 1.0, %v674_v14 }
 0xa0c   :  { %v676_v16 = vmul.f32 %v1554_v13, %v675_v15 }
 0xa0e   :  { %v677_v17 = vadd.f32 %v1554_v13, %v676_v16 }
 0xa10   :  { %v681_v20 = vsel %vm680_vm11, %v1554_v13, %v677_v17 }
 0xa11   :  { %v686_v23 = vsel %vm683_vm12, %v685_v21, %v681_v20 }
 0xa12   :  { %v689_v32 = vmul.f32 %v686_v23, %v1947_v30  ;;  %v40_v30 = vld [vmem:[%s2176_s0 + $0x28] sm:$0xff] }
 0xa13   :  { %1415 = vmatmul.msk.f32.gmra.mxu0 %vm49_vm0, %v40_v30 }
 0xa46   :  { %v632_v10 = vpop.permute.xlu2 %631 }
 0xa47   :  { %v634_v12 = vmul.f32 %v632_v10, %v626_v11 }
 0xa49   :  { %636 = vrot.lane.b32.xlu1 %v634_v12, %s1640_s27 }
 0xa66   :  { %v692_v22 = vpop.permute.xlu1 %691 }
 0xa67   :  { %v694_v24 = vmul.f32 %v692_v22, %v686_v23 }
 0xa69   :  { %696 = vrot.lane.b32.xlu0 %v694_v24, %s1640_s27 }
 0xa90   :  { %v106_v53 = vpop.f32.mrf.mxu0 }
 0xa91   :  { %v107_v54 = vadd.f32 %v1751_v8, %v106_v53 }
 0xabb   :  { %v637_v26 = vpop.permute.xlu1 %636 }
 0xabc   :  { %v1983_v27 = vadd.f32 %v637_v26, %v629_v25 }
 0xabe   :  { %1555 = vtanh.f32 %v1983_v27 }
 0xac4   :  { %v1556_v29 = vpop.eup %1555 }
 0xac5   :  { %642 = vrot.lane.b32.xlu0 %v1556_v29, %s1640_s27 }
 0xadb   :  { %v697_v41 = vpop.permute.xlu0 %696 }
 0xadc   :  { %v1988_v31 = vadd.f32 %v697_v41, %v689_v32 }
 0xade   :  { %1557 = vtanh.f32 %v1988_v31 }
 0xae4   :  { %v1558_v47 = vpop.eup %1557 }
 0xae5   :  { %702 = vrot.lane.b32.xlu2 %v1558_v47, %s1640_s27 }
 0xb37   :  { %v643_v49 = vpop.permute.xlu0 %642 }
 0xb38   :  { %v1992_v45 = vmul.f32 %v643_v49, %v626_v11 }
 0xb3a   :  { %711 = vrot.lane.b32.xlu2 %v1992_v45, %s1642_s2 }
 0xb3f   :  { %v703_v48 = vpop.permute.xlu2 %702 }
 0xb40   :  { %v705_v50 = vmul.f32 %v703_v48, %v686_v23 }
 0xb42   :  { %707 = vrot.lane.b32.xlu1 %v705_v50, %s1641_s22 }
 0xb94   :  { %v712_v43 = vpop.permute.xlu2 %711 }
 0xbb4   :  { %v708_v51 = vpop.permute.xlu1 %707 }
 0xbb5   :  { %v714_v40 = vsel %vm128_vm5, %v708_v51, %v712_v43  ;;  %1437 = vmatmul.msk.f32.vlgmr.msrb.gmra.mxu3 %vm128_vm5, %v708_v51  ;;  %v2040_v51 = vld [vmem:[%s2177_s3] ss:$0 sm:$0xff] }
 0xbb6   :  { %1435 = vmatmul.msk.f32.vlgmr.msrb.gmra.mxu2 %vm198_vm6, %v714_v40  ;;  %1047 = vmatpush.msrb.mxu3 %v1709_v0 }
 0xbb8   :  { %1048 = vmatpush.msrb.mxu3 %v1717_v2 }
 0xbba   :  { %1049 = vmatpush.msrb.mxu3 %v1729_v5 }
 0xbbc   :  { %1050 = vmatpush.msrb.mxu3 %v1737_v6 }
 0xc38   :  { %v794_v55 = vpop.f32.mrf.mxu3 }
 0xc39   :  { %v797_v56 = vadd.f32 %v794_v55, %v107_v54  ;;  %v735_v33 = vpop.f32.mrf.mxu2 }
 0xc3a   :  { %v736_v57 = vadd.f32 %v1855_v46, %v735_v33 }
 0xc3b   :  { %1559 = vtanh.f32 %v797_v56  ;;  %v1438_v0 = vmul.f32 -1.442695, %v797_v56 }
 0xc3c   :  { %1561 = vtanh.f32 %v736_v57  ;;  %v1436_v2 = vmul.f32 -1.442695, %v736_v57 }
 0xc3d   :  { %1563 = vpow2.f32 %v1438_v0 }
 0xc3e   :  { %1565 = vpow2.f32 %v1436_v2 }
 0xc41   :  { %v1560_v58 = vpop.eup %1559 }
 0xc42   :  { %v1562_v34 = vpop.eup %1561  ;;  %820 = vrot.lane.b32.xlu0 %v1560_v58, %s1640_s27 }
 0xc43   :  { %760 = vrot.lane.b32.xlu1 %v1562_v34, %s1640_s27  ;;  %v1564_v5 = vpop.eup %1563 }
 0xc44   :  { %v1566_v6 = vpop.eup %1565  ;;  %v801_v8 = vadd.f32 1.0, %v1564_v5 }
 0xc45   :  { %v741_v59 = vadd.f32 1.0, %v1566_v6 }
 0xc46   :  { %1567 = vrcp.f32 %v801_v8  ;;  %v813_v63 = vand.u32 2147483648, %v801_v8  ;;  %vm807_vm15 = vweird.f32 %v801_v8  ;;  %v811_v3 = vand.u32 2147483647, %v801_v8 }
 0xc47   :  { %1569 = vrcp.f32 %v741_v59  ;;  %v753_v4 = vand.u32 2147483648, %v741_v59  ;;  %vm747_vm2 = vweird.f32 %v741_v59  ;;  %v751_v7 = vand.u32 2147483647, %v741_v59 }
 0xc48   :  { %v814_v10 = vor.u32 1.1754944e-38, %v813_v63  ;;  %vm812_vm4 = vcmp.eq.f32.partialorder %v811_v3, 8.507059e+37 }
 0xc49   :  { %v754_v12 = vor.u32 1.1754944e-38, %v753_v4  ;;  %vm752_vm7 = vcmp.eq.f32.partialorder %v751_v7, 8.507059e+37 }
 0xc4c   :  { %v1568_v35 = vpop.eup %1567 }
 0xc4d   :  { %v1570_v36 = vpop.eup %1569  ;;  %v803_v37 = vmul.f32 %v1568_v35, %v801_v8  ;;  %vm808_vm13 = vweird.f32 %v1568_v35 }
 0xc4e   :  { %v743_v38 = vmul.f32 %v1570_v36, %v741_v59  ;;  %vm748_vm14 = vweird.f32 %v1570_v36  ;;  %vm809_vm1 = vmor %vm807_vm15, %vm808_vm13 }
 0xc4f   :  { %v804_v39 = vsub.f32 1.0, %v803_v37  ;;  %vm749_vm3 = vmor %vm747_vm2, %vm748_vm14 }
 0xc50   :  { %v744_v42 = vsub.f32 1.0, %v743_v38 }
 0xc51   :  { %v805_v60 = vmul.f32 %v1568_v35, %v804_v39 }
 0xc52   :  { %v745_v61 = vmul.f32 %v1570_v36, %v744_v42 }
 0xc53   :  { %v806_v62 = vadd.f32 %v1568_v35, %v805_v60 }
 0xc54   :  { %v746_v1 = vadd.f32 %v1570_v36, %v745_v61 }
 0xc55   :  { %v810_v9 = vsel %vm809_vm1, %v1568_v35, %v806_v62 }
 0xc56   :  { %v750_v11 = vsel %vm749_vm3, %v1570_v36, %v746_v1  ;;  %v815_v13 = vsel %vm812_vm4, %v814_v10, %v810_v9 }
 0xc57   :  { %v755_v17 = vsel %vm752_vm7, %v754_v12, %v750_v11  ;;  %v818_v19 = vmul.f32 %v815_v13, %v1988_v31 }
 0xc58   :  { %v758_v23 = vmul.f32 %v755_v17, %v1983_v27  ;;  %v41_v27 = vld [vmem:[%s2176_s0 + $0x30] sm:$0xff] }
 0xc59   :  { %1416 = vmatmul.msk.f32.gmra.mxu0 %vm49_vm0, %v41_v27 }
 0xcb4   :  { %v821_v14 = vpop.permute.xlu0 %820 }
 0xcb5   :  { %v823_v15 = vmul.f32 %v821_v14, %v815_v13  ;;  %v761_v16 = vpop.permute.xlu1 %760 }
 0xcb6   :  { %v763_v18 = vmul.f32 %v761_v16, %v755_v17 }
 0xcb7   :  { %825 = vrot.lane.b32.xlu2 %v823_v15, %s1640_s27 }
 0xcb8   :  { %765 = vrot.lane.b32.xlu0 %v763_v18, %s1640_s27 }
 0xcd6   :  { %v109_v50 = vpop.f32.mrf.mxu0 }
 0xcd7   :  { %v110_v40 = vadd.f32 %v2040_v51, %v109_v50 }
 0xd11   :  { %v826_v20 = vpop.permute.xlu2 %825 }
 0xd12   :  { %v2015_v21 = vadd.f32 %v826_v20, %v818_v19 }
 0xd14   :  { %1571 = vtanh.f32 %v2015_v21 }
 0xd1a   :  { %v1572_v22 = vpop.eup %1571 }
 0xd1b   :  { %831 = vrot.lane.b32.xlu1 %v1572_v22, %s1640_s27 }
 0xd2a   :  { %v766_v24 = vpop.permute.xlu0 %765 }
 0xd2b   :  { %v2020_v25 = vadd.f32 %v766_v24, %v758_v23 }
 0xd2d   :  { %1573 = vtanh.f32 %v2020_v25 }
 0xd33   :  { %v1574_v26 = vpop.eup %1573 }
 0xd34   :  { %771 = vrot.lane.b32.xlu2 %v1574_v26, %s1640_s27 }
 0xd8d   :  { %v832_v29 = vpop.permute.xlu1 %831 }
 0xd8e   :  { %v834_v32 = vmul.f32 %v832_v29, %v815_v13  ;;  %v772_v41 = vpop.permute.xlu2 %771 }
 0xd8f   :  { %v2024_v31 = vmul.f32 %v772_v41, %v755_v17 }
 0xd90   :  { %836 = vrot.lane.b32.xlu0 %v834_v32, %s1641_s22 }
 0xd91   :  { %840 = vrot.lane.b32.xlu1 %v2024_v31, %s1642_s2 }
 0xe02   :  { %v837_v47 = vpop.permute.xlu0 %836 }
 0xe03   :  { %v841_v49 = vpop.permute.xlu1 %840  ;;  %1441 = vmatmul.msk.f32.vlgmr.msra.gmra.mxu3 %vm128_vm5, %v837_v47 }
 0xe04   :  { %v843_v48 = vsel %vm128_vm5, %v837_v47, %v841_v49 }
 0xe05   :  { %1439 = vmatmul.msk.f32.vlgmr.msrb.gmra.mxu1 %vm198_vm6, %v843_v48 }
 0xe82   :  { %v864_v30 = vpop.f32.mrf.mxu1 }
 0xe83   :  { %v865_v43 = vadd.f32 %v1855_v46, %v864_v30 }
 0xe85   :  { %1575 = vtanh.f32 %v865_v43  ;;  %v1440_v33 = vmul.f32 -1.442695, %v865_v43  ;;  %v2074_v43 = vld [vmem:[%s2179_s5] ss:$0 sm:$0xff] }
 0xe86   :  { %v923_v53 = vpop.f32.mrf.mxu3 }
 0xe87   :  { %v926_v54 = vadd.f32 %v923_v53, %v110_v40 }
 0xe89   :  { %1577 = vtanh.f32 %v926_v54  ;;  %v1442_v0 = vmul.f32 -1.442695, %v926_v54 }
 0xe8a   :  { %1579 = vpow2.f32 %v1440_v33 }
 0xe8b   :  { %v1576_v55 = vpop.eup %1575 }
 0xe8c   :  { %889 = vrot.lane.b32.xlu2 %v1576_v55, %s1640_s27 }
 0xe8f   :  { %v1578_v56 = vpop.eup %1577 }
 0xe90   :  { %949 = vrot.lane.b32.xlu0 %v1578_v56, %s1640_s27  ;;  %v1580_v46 = vpop.eup %1579 }
 0xe91   :  { %v870_v57 = vadd.f32 1.0, %v1580_v46 }
 0xe93   :  { %1581 = vrcp.f32 %v870_v57  ;;  %v882_v59 = vand.u32 2147483648, %v870_v57  ;;  %vm876_vm9 = vweird.f32 %v870_v57  ;;  %v880_v35 = vand.u32 2147483647, %v870_v57 }
 0xe94   :  { %1583 = vpow2.f32 %v1442_v0 }
 0xe95   :  { %v883_v38 = vor.u32 1.1754944e-38, %v882_v59  ;;  %vm881_vm11 = vcmp.eq.f32.partialorder %v880_v35, 8.507059e+37 }
 0xe99   :  { %v1582_v58 = vpop.eup %1581 }
 0xe9a   :  { %v872_v34 = vmul.f32 %v1582_v58, %v870_v57  ;;  %v1584_v6 = vpop.eup %1583  ;;  %vm877_vm8 = vweird.f32 %v1582_v58 }
 0xe9b   :  { %v930_v36 = vadd.f32 1.0, %v1584_v6  ;;  %vm878_vm10 = vmor %vm876_vm9, %vm877_vm8 }
 0xe9c   :  { %v873_v2 = vsub.f32 1.0, %v872_v34 }
 0xe9d   :  { %1585 = vrcp.f32 %v930_v36  ;;  %v942_v4 = vand.u32 2147483648, %v930_v36  ;;  %vm936_vm13 = vweird.f32 %v930_v36  ;;  %v940_v7 = vand.u32 2147483647, %v930_v36 }
 0xe9e   :  { %v874_v5 = vmul.f32 %v1582_v58, %v873_v2 }
 0xe9f   :  { %v943_v10 = vor.u32 1.1754944e-38, %v942_v4  ;;  %vm941_vm15 = vcmp.eq.f32.partialorder %v940_v7, 8.507059e+37 }
 0xea0   :  { %v875_v8 = vadd.f32 %v1582_v58, %v874_v5 }
 0xea2   :  { %v879_v37 = vsel %vm878_vm10, %v1582_v58, %v875_v8 }
 0xea3   :  { %v884_v42 = vsel %vm881_vm11, %v883_v38, %v879_v37  ;;  %v1586_v61 = vpop.eup %1585 }
 0xea4   :  { %v932_v62 = vmul.f32 %v1586_v61, %v930_v36  ;;  %vm937_vm12 = vweird.f32 %v1586_v61  ;;  %v887_v14 = vmul.f32 %v884_v42, %v2020_v25 }
 0xea5   :  { %vm938_vm14 = vmor %vm936_vm13, %vm937_vm12  ;;  %vm1284_vm13 = vcmask 7168  }
 0xea6   :  { %v933_v63 = vsub.f32 1.0, %v932_v62 }
 0xea8   :  { %v934_v1 = vmul.f32 %v1586_v61, %v933_v63 }
 0xeaa   :  { %v935_v3 = vadd.f32 %v1586_v61, %v934_v1 }
 0xeac   :  { %v939_v9 = vsel %vm938_vm14, %v1586_v61, %v935_v3  ;;  %vm1286_vm14 = vcmask 15360  }
 0xead   :  { %v944_v12 = vsel %vm941_vm15, %v943_v10, %v939_v9  ;;  %vm1288_vm15 = vcmask 23552  }
 0xeae   :  { %v947_v17 = vmul.f32 %v944_v12, %v2015_v21  ;;  %v42_v21 = vld [vmem:[%s2176_s0 + $0x38] sm:$0xff] }
 0xeaf   :  { %1417 = vmatmul.msk.f32.gmra.mxu0 %vm49_vm0, %v42_v21  ;;  %v1162_v21 = vld [vmem:[%s2180_s6] sm:$0xff] }
 0xee6   :  { %v890_v39 = vpop.permute.xlu2 %889 }
 0xee7   :  { %v892_v60 = vmul.f32 %v890_v39, %v884_v42 }
 0xee9   :  { %894 = vrot.lane.b32.xlu1 %v892_v60, %s1640_s27 }
 0xf02   :  { %v950_v11 = vpop.permute.xlu0 %949 }
 0xf03   :  { %v952_v13 = vmul.f32 %v950_v11, %v944_v12 }
 0xf05   :  { %954 = vrot.lane.b32.xlu2 %v952_v13, %s1640_s27 }
 0xf2c   :  { %v112_v27 = vpop.f32.mrf.mxu0 }
 0xf2d   :  { %v113_v47 = vadd.f32 %v2040_v51, %v112_v27 }
 0xf5b   :  { %v895_v15 = vpop.permute.xlu1 %894 }
 0xf5c   :  { %v2048_v16 = vadd.f32 %v895_v15, %v887_v14 }
 0xf5e   :  { %1587 = vtanh.f32 %v2048_v16 }
 0xf5f   :  { %v955_v18 = vpop.permute.xlu2 %954 }
 0xf60   :  { %v2052_v19 = vadd.f32 %v955_v18, %v947_v17 }
 0xf62   :  { %1589 = vtanh.f32 %v2052_v19 }
 0xf64   :  { %v1588_v20 = vpop.eup %1587 }
 0xf65   :  { %900 = vrot.lane.b32.xlu0 %v1588_v20, %s1640_s27 }
 0xf68   :  { %v1590_v22 = vpop.eup %1589 }
 0xf69   :  { %960 = vrot.lane.b32.xlu1 %v1590_v22, %s1640_s27 }
 0xfd7   :  { %v901_v23 = vpop.permute.xlu0 %900 }
 0xfd8   :  { %v2057_v24 = vmul.f32 %v901_v23, %v884_v42 }
 0xfda   :  { %969 = vrot.lane.b32.xlu0 %v2057_v24, %s1642_s2 }
 0xfdb   :  { %v961_v25 = vpop.permute.xlu1 %960 }
 0xfdc   :  { %v963_v26 = vmul.f32 %v961_v25, %v944_v12  ;;  %v1164_v25 = vld [vmem:[%s2180_s6 + $0x10] sm:$0xff] }
 0xfde   :  { %965 = vrot.lane.b32.xlu2 %v963_v26, %s1641_s22  ;;  %v1163_v26 = vld [vmem:[%s2180_s6 + $0x8] sm:$0xff] }
0x1038   :  { %v966_v29 = vpop.permute.xlu2 %965 }
0x1039   :  { %1445 = vmatmul.msk.f32.vlgmr.msrb.gmra.mxu3 %vm128_vm5, %v966_v29 }
0x104c   :  { %v970_v32 = vpop.permute.xlu0 %969 }
0x104d   :  { %v972_v41 = vsel %vm128_vm5, %v966_v29, %v970_v32 }
0x104e   :  { %1443 = vmatmul.msk.f32.vlgmr.msra.gmra.mxu2 %vm198_vm6, %v972_v41 }
0x10bc   :  { %v1052_v49 = vpop.f32.mrf.mxu3 }
0x10bd   :  { %v1055_v48 = vadd.f32 %v1052_v49, %v113_v47 }
0x10bf   :  { %1591 = vtanh.f32 %v1055_v48  ;;  %v1446_v54 = vmul.f32 -1.442695, %v1055_v48 }
0x10c5   :  { %v1592_v50 = vpop.eup %1591 }
0x10c6   :  { %1078 = vrot.lane.b32.xlu2 %v1592_v50, %s1640_s27 }
0x10d1   :  { %v993_v30 = vpop.f32.mrf.mxu2 }
0x10d2   :  { %v994_v40 = vadd.f32 %v2074_v43, %v993_v30 }
0x10d4   :  { %1593 = vtanh.f32 %v994_v40  ;;  %v1444_v6 = vmul.f32 -1.442695, %v994_v40 }
0x10d5   :  { %1595 = vpow2.f32 %v1446_v54 }
0x10da   :  { %v1594_v53 = vpop.eup %1593 }
0x10db   :  { %1018 = vrot.lane.b32.xlu1 %v1594_v53, %s1640_s27  ;;  %v1596_v51 = vpop.eup %1595 }
0x10dc   :  { %v1059_v55 = vadd.f32 1.0, %v1596_v51 }
0x10de   :  { %1597 = vrcp.f32 %v1059_v55  ;;  %v1071_v34 = vand.u32 2147483648, %v1059_v55  ;;  %vm1065_vm1 = vweird.f32 %v1059_v55  ;;  %v1069_v0 = vand.u32 2147483647, %v1059_v55 }
0x10df   :  { %1599 = vpow2.f32 %v1444_v6 }
0x10e0   :  { %v1072_v5 = vor.u32 1.1754944e-38, %v1071_v34  ;;  %vm1070_vm3 = vcmp.eq.f32.partialorder %v1069_v0, 8.507059e+37 }
0x10e4   :  { %v1598_v56 = vpop.eup %1597 }
0x10e5   :  { %v1061_v33 = vmul.f32 %v1598_v56, %v1059_v55  ;;  %vm1066_vm0 = vweird.f32 %v1598_v56  ;;  %v1600_v36 = vpop.eup %1599 }
0x10e6   :  { %vm1067_vm2 = vmor %vm1065_vm1, %vm1066_vm0  ;;  %v999_v37 = vadd.f32 1.0, %v1600_v36  ;;  %vm1290_vm0 = vcmask 31744   ;;  %vm1292_vm1 = vcmask 39936  }
0x10e7   :  { %v1062_v46 = vsub.f32 1.0, %v1061_v33 }
0x10e8   :  { %1601 = vrcp.f32 %v999_v37  ;;  %v1011_v62 = vand.u32 2147483648, %v999_v37  ;;  %vm1005_vm7 = vweird.f32 %v999_v37  ;;  %v1009_v63 = vand.u32 2147483647, %v999_v37 }
0x10e9   :  { %v1063_v57 = vmul.f32 %v1598_v56, %v1062_v46 }
0x10ea   :  { %v1012_v3 = vor.u32 1.1754944e-38, %v1011_v62  ;;  %vm1010_vm9 = vcmp.eq.f32.partialorder %v1009_v63, 8.507059e+37 }
0x10eb   :  { %v1064_v58 = vadd.f32 %v1598_v56, %v1063_v57 }
0x10ed   :  { %v1068_v2 = vsel %vm1067_vm2, %v1598_v56, %v1064_v58  ;;  %vm1294_vm2 = vcmask 48128  }
0x10ee   :  { %v1073_v59 = vsel %vm1070_vm3, %v1072_v5, %v1068_v2  ;;  %v1602_v38 = vpop.eup %1601  ;;  %vm1296_vm3 = vcmask 56320  }
0x10ef   :  { %v1001_v39 = vmul.f32 %v1602_v38, %v999_v37  ;;  %vm1006_vm4 = vweird.f32 %v1602_v38  ;;  %v1076_v10 = vmul.f32 %v1073_v59, %v2052_v19  ;;  %v1485_v37 = vld [vmem:[%s2181_s7] ss:$0 sm:$0xff] }
0x10f0   :  { %vm1007_vm8 = vmor %vm1005_vm7, %vm1006_vm4  ;;  %vm1298_vm4 = vcmask 64512  }
0x10f1   :  { %v1002_v42 = vsub.f32 1.0, %v1001_v39 }
0x10f3   :  { %v1003_v60 = vmul.f32 %v1602_v38, %v1002_v42 }
0x10f5   :  { %v1004_v61 = vadd.f32 %v1602_v38, %v1003_v60 }
0x10f7   :  { %v1008_v1 = vsel %vm1007_vm8, %v1602_v38, %v1004_v61 }
0x10f8   :  { %v1013_v7 = vsel %vm1010_vm9, %v1012_v3, %v1008_v1 }
0x10f9   :  { %v1016_v14 = vmul.f32 %v1013_v7, %v2048_v16  ;;  %v1165_v16 = vld [vmem:[%s2180_s6 + $0x18] sm:$0xff] }
0x10fa   :  { %1458 = vmatpush.msra.mxu1 %v1165_v16  ;;  %1211 = vmatpush.msra.mxu0 %v1165_v16 }
0x10fc   :  { %1459 = vmatpush.msra.mxu1 %v1164_v25  ;;  %1212 = vmatpush.msra.mxu0 %v1164_v25 }
0x10fe   :  { %1460 = vmatpush.msra.mxu1 %v1163_v26  ;;  %1213 = vmatpush.msra.mxu0 %v1163_v26 }
0x1100   :  { %1461 = vmatpush.msra.mxu1 %v1162_v21  ;;  %1214 = vmatpush.msra.mxu0 %v1162_v21 }
0x1120   :  { %v1079_v8 = vpop.permute.xlu2 %1078 }
0x1121   :  { %v1081_v35 = vmul.f32 %v1079_v8, %v1073_v59 }
0x1123   :  { %1083 = vrot.lane.b32.xlu1 %v1081_v35, %s1640_s27 }
0x114d   :  { %v1019_v4 = vpop.permute.xlu1 %1018 }
0x114e   :  { %v1021_v9 = vmul.f32 %v1019_v4, %v1013_v7 }
0x1150   :  { %1023 = vrot.lane.b32.xlu0 %v1021_v9, %s1640_s27 }
0x1195   :  { %v1084_v11 = vpop.permute.xlu1 %1083 }
0x1196   :  { %v1086_v12 = vadd.f32 %v1084_v11, %v1076_v10 }
0x1198   :  { %1603 = vtanh.f32 %v1086_v12 }
0x119e   :  { %v1604_v13 = vpop.eup %1603 }
0x119f   :  { %1089 = vrot.lane.b32.xlu0 %v1604_v13, %s1640_s27 }
0x11c2   :  { %v1024_v15 = vpop.permute.xlu0 %1023 }
0x11c3   :  { %v1026_v17 = vadd.f32 %v1024_v15, %v1016_v14 }
0x11c5   :  { %1605 = vtanh.f32 %v1026_v17 }
0x11cb   :  { %v1606_v18 = vpop.eup %1605 }
0x11cc   :  { %1029 = vrot.lane.b32.xlu2 %v1606_v18, %s1640_s27 }
0x1211   :  { %v1090_v20 = vpop.permute.xlu0 %1089 }
0x1212   :  { %v1092_v22 = vmul.f32 %v1090_v20, %v1073_v59 }
0x1214   :  { %1094 = vrot.lane.b32.xlu1 %v1092_v22, %s1641_s22 }
0x1226   :  { %v1030_v23 = vpop.permute.xlu2 %1029 }
0x1227   :  { %v2085_v19 = vmul.f32 %v1030_v23, %v1013_v7 }
0x1229   :  { %1098 = vrot.lane.b32.xlu2 %v2085_v19, %s1642_s2 }
0x1231   :  { %1169 = vrot.lane.b32.xlu2 %v1916_v52, %s1641_s22 }
0x1239   :  { %1173 = vrot.lane.b32.xlu2 %v1992_v45, %s1641_s22 }
0x1241   :  { %1179 = vrot.lane.b32.xlu2 %v2085_v19, %s1641_s22 }
0x1283   :  { %v1099_v29 = vpop.permute.xlu2 %1098 }
0x1286   :  { %v1095_v32 = vpop.permute.xlu1 %1094 }
0x1287   :  { %v1101_v41 = vsel %vm128_vm5, %v1095_v32, %v1099_v29 }
0x1288   :  { %1447 = vmatmul.msk.f32.vlgmr.msrb.gmra.mxu0 %vm198_vm6, %v1101_v41 }
0x128b   :  { %v1170_v27 = vpop.permute.xlu2 %1169 }
0x128c   :  { %1450 = vmatmul.msk.f32.vlgmr.msra.gmra.mxu1 %vm128_vm5, %v1170_v27 }
0x1293   :  { %v1174_v35 = vpop.permute.xlu2 %1173 }
0x129b   :  { %v1180_v3 = vpop.permute.xlu2 %1179 }
0x1305   :  { %v1122_v47 = vpop.f32.mrf.mxu0 }
0x1306   :  { %v1123_v49 = vadd.f32 %v2074_v43, %v1122_v47 }
0x1308   :  { %1607 = vtanh.f32 %v1123_v49  ;;  %v1448_v50 = vmul.f32 -1.442695, %v1123_v49 }
0x1309   :  { %v1219_v36 = vpop.f32.mrf.mxu1 }
0x130a   :  { %1609 = vpow2.f32 %v1448_v50 }
0x130e   :  { %v1608_v48 = vpop.eup %1607 }
0x130f   :  { %1147 = vrot.lane.b32.xlu0 %v1608_v48, %s1640_s27 }
0x1310   :  { %v1610_v30 = vpop.eup %1609 }
0x1311   :  { %v1128_v40 = vadd.f32 1.0, %v1610_v30 }
0x1313   :  { %1611 = vrcp.f32 %v1128_v40  ;;  %v1140_v33 = vand.u32 2147483648, %v1128_v40  ;;  %vm1134_vm10 = vweird.f32 %v1128_v40  ;;  %v1138_v46 = vand.u32 2147483647, %v1128_v40 }
0x1315   :  { %v1141_v57 = vor.u32 1.1754944e-38, %v1140_v33  ;;  %vm1139_vm12 = vcmp.eq.f32.partialorder %v1138_v46, 8.507059e+37 }
0x1319   :  { %v1612_v53 = vpop.eup %1611 }
0x131a   :  { %v1130_v54 = vmul.f32 %v1612_v53, %v1128_v40  ;;  %vm1135_vm6 = vweird.f32 %v1612_v53 }
0x131b   :  { %vm1136_vm11 = vmor %vm1134_vm10, %vm1135_vm6 }
0x131c   :  { %v1131_v51 = vsub.f32 1.0, %v1130_v54 }
0x131e   :  { %v1132_v55 = vmul.f32 %v1612_v53, %v1131_v51 }
0x1320   :  { %v1133_v56 = vadd.f32 %v1612_v53, %v1132_v55 }
0x1322   :  { %v1137_v43 = vsel %vm1136_vm11, %v1612_v53, %v1133_v56 }
0x1323   :  { %v1142_v34 = vsel %vm1139_vm12, %v1141_v57, %v1137_v43 }
0x1324   :  { %v1145_v2 = vmul.f32 %v1142_v34, %v1026_v17 }
0x1381   :  { %v1148_v58 = vpop.permute.xlu0 %1147 }
0x1382   :  { %v1150_v0 = vmul.f32 %v1148_v58, %v1142_v34 }
0x1384   :  { %1152 = vrot.lane.b32.xlu1 %v1150_v0, %s1640_s27 }
0x138c   :  { %1171 = vrot.lane.b32.xlu1 %v1957_v28, %s1641_s22 }
0x1394   :  { %1177 = vrot.lane.b32.xlu1 %v2057_v24, %s1641_s22 }
0x13f6   :  { %v1153_v5 = vpop.permute.xlu1 %1152 }
0x13f7   :  { %v1155_v6 = vadd.f32 %v1153_v5, %v1145_v2 }
0x13f9   :  { %1613 = vtanh.f32 %v1155_v6 }
0x13fa   :  { %1615 = vtanh.f32 %v1219_v36 }
0x13fe   :  { %v1172_v8 = vpop.permute.xlu1 %1171 }
0x13ff   :  { %v1614_v59 = vpop.eup %1613  ;;  %1451 = vmatmul.msk.f32.gmra.mxu1 %vm128_vm5, %v1172_v8 }
0x1400   :  { %1158 = vrot.lane.b32.xlu0 %v1614_v59, %s1640_s27  ;;  %v1616_v38 = vpop.eup %1615 }
0x1401   :  { %v1253_v39 = vmul.f32 %v1616_v38, %v1485_v37 }
0x1403   :  { %v1263_v42 = vsel %vm128_vm5, %v1253_v39, 0.0 }
0x1406   :  { %v1178_v63 = vpop.permute.xlu1 %1177 }
0x1407   :  { %1452 = vmatmul.msk.f32.gmra.mxu1 %vm128_vm5, %v1174_v35 }
0x1408   :  { %1175 = vrot.lane.b32.xlu0 %v2024_v31, %s1641_s22 }
0x1410   :  { %1167 = vrot.lane.b32.xlu0 %v1872_v44, %s1641_s22 }
0x143a   :  { %1264 = vadd.xlane.f32.xlu0 %v1263_v42  ;;  %v1643_v42 = vmov 2  }
0x143b   :  { %1476 = vset.pattern.permute.xlu1 %v1643_v42 }
0x1472   :  { %v1159_v60 = vpop.permute.xlu0 %1158 }
0x1473   :  { %v2128_v61 = vmul.f32 %v1159_v60, %v1142_v34  ;;  %v1644_v60 = vmov 1  }
0x1474   :  { %1475 = vset.pattern.permute.xlu0 %v1644_v60 }
0x1475   :  { %1181 = vrot.lane.b32.xlu1 %v2128_v61, %s1641_s22 }
0x147a   :  { %v1176_v62 = vpop.permute.xlu0 %1175 }
0x147b   :  { %1453 = vmatmul.msk.f32.gmra.mxu1 %vm128_vm5, %v1176_v62  ;;  %v1645_v62 = vmov 0  }
0x147c   :  { %v1222_v4 = vpop.f32.mrf.mxu1  ;;  %1474 = vset.pattern.permute.xlu2 %v1645_v62 }
0x147d   :  { %1617 = vtanh.f32 %v1222_v4 }
0x1482   :  { %v1168_v1 = vpop.permute.xlu0 %1167 }
0x1483   :  { %1449 = vmatmul.msk.f32.vlgmr.msra.gmra.mxu0 %vm128_vm5, %v1168_v1  ;;  %1454 = vmatmul.msk.f32.gmra.mxu1 %vm128_vm5, %v1178_v63  ;;  %v1618_v7 = vpop.eup %1617 }
0x1484   :  { %v1254_v9 = vmul.f32 %v1618_v7, %v1485_v37  ;;  %v1225_v12 = vpop.f32.mrf.mxu1 }
0x1486   :  { %v1266_v10 = vsel %vm128_vm5, %v1254_v9, 0.0 }
0x148b   :  { %1455 = vmatmul.msk.f32.gmra.mxu1 %vm128_vm5, %v1180_v3 }
0x149f   :  { %1267 = vadd.xlane.f32.xlu1 %v1266_v10 }
0x14ad   :  { %v1265_v55 = vpop.xlane.xlu0 %1264 }
0x14e7   :  { %v1182_v11 = vpop.permute.xlu1 %1181 }
0x14e8   :  { %1456 = vmatmul.msk.f32.gmra.mxu1 %vm128_vm5, %v1182_v11 }
0x14f8   :  { %v1228_v13 = vpop.f32.mrf.mxu1 }
0x1500   :  { %v1216_v14 = vpop.f32.mrf.mxu0  ;;  %v1231_v15 = vpop.f32.mrf.mxu1 }
0x1501   :  { %1619 = vtanh.f32 %v1216_v14 }
0x1502   :  { %1621 = vtanh.f32 %v1231_v15 }
0x1503   :  { %1623 = vtanh.f32 %v1225_v12 }
0x1507   :  { %v1620_v17 = vpop.eup %1619 }
0x1508   :  { %v1622_v18 = vpop.eup %1621  ;;  %v1234_v20 = vpop.f32.mrf.mxu1  ;;  %v1252_v22 = vmul.f32 %v1620_v17, %v1485_v37  ;;  %v1646_v17 = vmov 4  }
0x1509   :  { %1625 = vtanh.f32 %v1234_v20  ;;  %v1257_v23 = vmul.f32 %v1622_v18, %v1485_v37  ;;  %v1624_v25 = vpop.eup %1623  ;;  %v1647_v18 = vmov 7   ;;  %v1648_v20 = vmov 3  }
0x150a   :  { %v1260_v16 = vsel %vm128_vm5, %v1252_v22, 0.0  ;;  %1627 = vtanh.f32 %v1228_v13  ;;  %v1255_v21 = vmul.f32 %v1624_v25, %v1485_v37  ;;  %v1649_v22 = vmov 6   ;;  %v1374_v25 = vld [vmem:[%s2182_s8 + $0x18] sm:$0xff] }
0x150b   :  { %1261 = vadd.xlane.f32.xlu2 %v1260_v16  ;;  %v1275_v26 = vsel %vm128_vm5, %v1257_v23, 0.0  ;;  %v1650_v23 = vmov 5   ;;  %1396 = vmatpush.msra.mxu3 %v1374_v25 }
0x150c   :  { %1276 = vadd.xlane.f32.xlu0 %v1275_v26  ;;  %v1269_v41 = vsel %vm128_vm5, %v1255_v21, 0.0  ;;  %v1373_v26 = vld [vmem:[%s2182_s8 + $0x10] sm:$0xff]  ;;  %v1372_v21 = vld [vmem:[%s2182_s8 + $0x8] sm:$0xff] }
0x150d   :  { %1397 = vmatpush.msra.mxu3 %v1373_v26 }
0x150f   :  { %v1626_v29 = vpop.eup %1625  ;;  %1398 = vmatpush.msra.mxu3 %v1372_v21 }
0x1510   :  { %v1258_v32 = vmul.f32 %v1626_v29, %v1485_v37  ;;  %v1628_v47 = vpop.eup %1627  ;;  %v1371_v29 = vld [vmem:[%s2182_s8] sm:$0xff] }
0x1511   :  { %v1256_v49 = vmul.f32 %v1628_v47, %v1485_v37  ;;  %1399 = vmatpush.msra.mxu3 %v1371_v29 }
0x1512   :  { %v1278_v27 = vsel %vm128_vm5, %v1258_v32, 0.0  ;;  %v1268_v33 = vpop.xlane.xlu1 %1267 }
0x1513   :  { %1270 = vadd.xlane.f32.xlu2 %v1269_v41  ;;  %1279 = vadd.xlane.f32.xlu1 %v1278_v27  ;;  %v1272_v48 = vsel %vm128_vm5, %v1256_v49, 0.0 }
0x151b   :  { %1273 = vadd.xlane.f32.xlu2 %v1272_v48 }
0x1565   :  { %v1237_v50 = vpop.f32.mrf.mxu1 }
0x1566   :  { %1629 = vtanh.f32 %v1237_v50 }
0x156c   :  { %v1630_v30 = vpop.eup %1629 }
0x156d   :  { %v1259_v40 = vmul.f32 %v1630_v30, %v1485_v37 }
0x156f   :  { %v1281_v53 = vsel %vm128_vm5, %v1259_v40, 0.0 }
0x1570   :  { %1282 = vadd.xlane.f32.xlu2 %v1281_v53 }
0x157e   :  { %v1262_v54 = vpop.xlane.xlu2 %1261 }
0x157f   :  { %v1285_v56 = vsel %vm1284_vm13, %v1262_v54, %v1265_v55  ;;  %v1277_v34 = vpop.xlane.xlu0 %1276 }
0x1580   :  { %v1287_v43 = vsel %vm1286_vm14, %v1285_v56, %v1268_v33 }
0x1586   :  { %v1271_v51 = vpop.xlane.xlu2 %1270  ;;  %v1280_v2 = vpop.xlane.xlu1 %1279 }
0x1587   :  { %v1289_v57 = vsel %vm1288_vm15, %v1287_v43, %v1271_v51 }
0x158e   :  { %v1274_v46 = vpop.xlane.xlu2 %1273 }
0x158f   :  { %v1291_v58 = vsel %vm1290_vm0, %v1289_v57, %v1274_v46 }
0x1590   :  { %v1293_v0 = vsel %vm1292_vm1, %v1291_v58, %v1277_v34 }
0x1591   :  { %v1295_v6 = vsel %vm1294_vm2, %v1293_v0, %v1280_v2 }
0x15e3   :  { %v1283_v5 = vpop.xlane.xlu2 %1282 }
0x15e4   :  { %v1297_v8 = vsel %vm1296_vm3, %v1295_v6, %v1283_v5 }
0x15e5   :  { %v1299_v59 = vsel %vm1298_vm4, %v1297_v8, -inf }
0x15e6   :  { %1300 = vmax.xlane.f32.xlu0 %v1299_v59 }
0x1659   :  { %v1301_v35 = vpop.xlane.xlu0 %1300 }
0x165a   :  { %v1302_v36 = vsub.f32 %v1297_v8, %v1301_v35 }
0x165c   :  { %v1303_v37 = vmul.f32 1.442695, %v1302_v36 }
0x165e   :  { %1631 = vpow2.f32 %v1303_v37 }
0x1664   :  { %v1632_v38 = vpop.eup %1631 }
0x1665   :  { %v1305_v39 = vsel %vm1298_vm4, %v1632_v38, 0.0 }
0x1666   :  { %1306 = vadd.xlane.f32.xlu1 %v1305_v39 }
0x16d9   :  { %v1307_v63 = vpop.xlane.xlu1 %1306 }
0x16da   :  { %1633 = vrcp.f32 %v1307_v63  ;;  %v1319_v7 = vand.u32 2147483648, %v1307_v63  ;;  %v1317_v10 = vand.u32 2147483647, %v1307_v63  ;;  %vm1313_vm8 = vweird.f32 %v1307_v63 }
0x16dc   :  { %v1320_v12 = vor.u32 1.1754944e-38, %v1319_v7  ;;  %vm1318_vm6 = vcmp.eq.f32.partialorder %v1317_v10, 8.507059e+37 }
0x16e0   :  { %v1634_v1 = vpop.eup %1633 }
0x16e1   :  { %v1309_v3 = vmul.f32 %v1634_v1, %v1307_v63  ;;  %vm1314_vm7 = vweird.f32 %v1634_v1 }
0x16e2   :  { %vm1315_vm9 = vmor %vm1313_vm8, %vm1314_vm7 }
0x16e3   :  { %v1310_v4 = vsub.f32 1.0, %v1309_v3 }
0x16e5   :  { %v1311_v9 = vmul.f32 %v1634_v1, %v1310_v4 }
0x16e7   :  { %v1312_v11 = vadd.f32 %v1634_v1, %v1311_v9 }
0x16e9   :  { %v1316_v13 = vsel %vm1315_vm9, %v1634_v1, %v1312_v11 }
0x16ea   :  { %v1321_v14 = vsel %vm1318_vm6, %v1320_v12, %v1316_v13 }
0x16eb   :  { %v1322_v15 = vmul.f32 %v1632_v38, %v1321_v14 }
0x16ed   :  { %1336 = vperm.xlu1 %1476, %v1322_v15   ;;  %1330 = vperm.xlu0 %1475, %v1322_v15  }
0x16ee   :  { %1325 = vperm.xlu2 %1474, %v1322_v15  }
0x16f5   :  { %1478 = vset.pattern.permute.xlu1 %v1646_v17  ;;  %1482 = vset.pattern.permute.xlu0 %v1647_v18 }
0x16f6   :  { %1477 = vset.pattern.permute.xlu2 %v1648_v20  ;;  %1348 = vperm.xlu1 %1478, %v1322_v15  }
0x16f7   :  { %1342 = vperm.xlu2 %1477, %v1322_v15  }
0x16fe   :  { %1480 = vset.pattern.permute.xlu1 %v1649_v22 }
0x16ff   :  { %1479 = vset.pattern.permute.xlu2 %v1650_v23  ;;  %1360 = vperm.xlu1 %1480, %v1322_v15  }
0x1700   :  { %1354 = vperm.xlu2 %1479, %v1322_v15  }
0x1708   :  { %1481 = vset.pattern.permute.xlu2 %v1647_v18 }
0x1709   :  { %1366 = vperm.xlu2 %1481, %v1322_v15  }
0x1748   :  { %v1326_v16 = vpop.permute.xlu2 %1325 }
0x1749   :  { %v1328_v49 = vmul.f32 %v1326_v16, %v1872_v44 }
0x1751   :  { %v1343_v32 = vpop.permute.xlu2 %1342 }
0x1752   :  { %v1345_v54 = vmul.f32 %v1343_v32, %v1992_v45  ;;  %v1486_v45 = vld [vmem:[%s2183_s9] ss:$0 sm:$0xff] }
0x175a   :  { %v1355_v30 = vpop.permute.xlu2 %1354 }
0x175b   :  { %v1357_v33 = vmul.f32 %v1355_v30, %v2057_v24 }
0x175f   :  { %v1337_v41 = vpop.permute.xlu1 %1336  ;;  %v1331_v27 = vpop.permute.xlu0 %1330 }
0x1760   :  { %v1333_v47 = vmul.f32 %v1331_v27, %v1916_v52  ;;  %v1339_v50 = vmul.f32 %v1337_v41, %v1957_v28 }
0x1762   :  { %v1334_v48 = vadd.f32 %v1333_v47, %v1328_v49 }
0x1763   :  { %v1367_v46 = vpop.permute.xlu2 %1366 }
0x1764   :  { %v1340_v40 = vadd.f32 %v1339_v50, %v1334_v48  ;;  %v1369_v44 = vmul.f32 %v1367_v46, %v2128_v61 }
0x1766   :  { %v1346_v55 = vadd.f32 %v1345_v54, %v1340_v40 }
0x1768   :  { %v1349_v53 = vpop.permute.xlu1 %1348 }
0x1769   :  { %v1351_v51 = vmul.f32 %v1349_v53, %v2024_v31 }
0x176b   :  { %v1352_v56 = vadd.f32 %v1351_v51, %v1346_v55 }
0x176d   :  { %v1358_v57 = vadd.f32 %v1357_v33, %v1352_v56 }
0x1771   :  { %v1361_v43 = vpop.permute.xlu1 %1360 }
0x1772   :  { %v1363_v52 = vmul.f32 %v1361_v43, %v2085_v19 }
0x1774   :  { %v1364_v58 = vadd.f32 %v1363_v52, %v1358_v57 }
0x1776   :  { %v1370_v28 = vadd.f32 %v1369_v44, %v1364_v58 }
0x1778   :  { %1380 = vrot.lane.b32.xlu0 %v1370_v28, %s1641_s22 }
0x17ea   :  { %v1381_v34 = vpop.permute.xlu0 %1380 }
0x17eb   :  { %1457 = vmatmul.msk.f32.vlgmr.msra.gmra.mxu3 %vm128_vm5, %v1381_v34 }
0x186e   :  { %v1401_v31 = vpop.f32.mrf.mxu3 }
0x186f   :  { %v1402_v24 = vadd.f32 %v1486_v45, %v1401_v31 }
0x1871   :  { %1635 = vtanh.f32 %v1402_v24 }
0x1877   :  { %v1636_v0 = vpop.eup %1635 }
0x1878   :  { %1405 = vst.msk [vmem:[%s2184_s10] sm:$0xff] %vm1286_vm14, %v1636_v0 }

</bundles_post_ra>
